<compile_context>
chip_gen: v6e
topology: v6e:2x2x1
jax: 0.10.0
libtpu: 0.0.40
codegen_flags: <defaults>
</compile_context>

<pallas_src>
import jax
import jax.numpy as jnp
from jax.experimental import pallas as pl
from jax.experimental.pallas import tpu as pltpu


# ------------------------------- helpers --------------------------------------
def _round_up(n, m):
    return ((n + m - 1) // m) * m


def _vmem_limit_bytes():
    # ~75% of physical VMEM, capped at 100 MiB (v5e/v6e: 128 MiB -> 96 MiB;
    # v7x: 64 MiB -> 48 MiB).  Fall back to the conservative 48 MiB if the HW
    # query is unavailable.
    try:
        cap = int(pltpu.get_tpu_info().vmem_capacity_bytes)
    except Exception:
        cap = 64 * 1024 * 1024
    return int(max(min(cap * 3 // 4, 100 * 1024 * 1024), 32 * 1024 * 1024))


def build_toeplitz_matrix_T(weight, T, T_pad):
    """Lower-triangular Toeplitz: M[t, i] = weight[t - i] for 0 <= t - i < len(weight);
    rows/cols beyond T (padding) are zeroed."""
    L = weight.shape[0]
    t = jnp.arange(T_pad)[:, None]
    i = jnp.arange(T_pad)[None, :]
    diff = t - i
    vals = weight[jnp.clip(diff, 0, L - 1)]
    mask = (diff >= 0) & (diff < L) & (t < T) & (i < T)
    return jnp.where(mask, vals, jnp.zeros_like(vals))


# --------------------- primary kernel: W resident in VMEM ---------------------
def _toeplitz_resident_kernel(w_ref, x_ref, b_ref, o_ref):
    # w_ref: (T_pad, T_pad) resident (constant index_map), already in compute dtype.
    # x_ref: (1, T_pad, te) in the original activation dtype (cast here, in VMEM).
    # b_ref: (T_pad, 1) f32.   o_ref: (1, T_pad, te).
    xt = x_ref[0].astype(w_ref.dtype)
    acc = jnp.dot(w_ref[...], xt, preferred_element_type=jnp.float32)
    o_ref[0] = (acc + b_ref[...]).astype(o_ref.dtype)


def _toeplitz_resident_call(W, xp, bias_col, *, out_dtype, te, vmem_limit):
    B, T_pad, E_pad = xp.shape
    ne = E_pad // te
    flops = 2 * B * T_pad * T_pad * E_pad  # dense upper bound (~2x the triangular work)
    bytes_accessed = (xp.size * xp.dtype.itemsize
                      + W.size * W.dtype.itemsize
                      + bias_col.size * 4
                      + B * T_pad * E_pad * jnp.dtype(out_dtype).itemsize)
    return pl.pallas_call(
        _toeplitz_resident_kernel,
        out_shape=jax.ShapeDtypeStruct((B, T_pad, E_pad), out_dtype),
        grid_spec=pltpu.PrefetchScalarGridSpec(
            num_scalar_prefetch=0,
            grid=(B, ne),
            in_specs=[
                # Constant block index -> W fetched to VMEM once and kept resident.
                pl.BlockSpec((T_pad, T_pad), lambda b, e: (0, 0)),
                pl.BlockSpec((1, T_pad, te), lambda b, e: (b, 0, e)),
                pl.BlockSpec((T_pad, 1), lambda b, e: (0, 0)),
            ],
            out_specs=pl.BlockSpec((1, T_pad, te), lambda b, e: (b, 0, e)),
        ),
        compiler_params=pltpu.CompilerParams(
            dimension_semantics=("parallel", "parallel"),
            vmem_limit_bytes=vmem_limit,
        ),
        cost_estimate=pl.CostEstimate(flops=flops, transcendentals=0,
                                      bytes_accessed=bytes_accessed),
    )(W, xp, bias_col)


# --------------- fallback kernel: W streamed over a k (reduction) axis --------
def _toeplitz_stream_kernel(w_ref, x_ref, b_ref, o_ref, acc_ref):
    # Grid = (B, T/tt, E/te, T/tt); axis 3 is the contraction axis (tk == tt).
    t = pl.program_id(1)
    k = pl.program_id(3)
    nk = pl.num_programs(3)

    @pl.when(k == 0)
    def _init():
        acc_ref[...] = jnp.zeros_like(acc_ref)

    # Lower-triangular W: block (t, k) is all-zero for k > t -> skip the matmul.
    @pl.when(k <= t)
    def _compute():
        acc_ref[...] += jnp.dot(w_ref[...], x_ref[0].astype(w_ref.dtype),
                                preferred_element_type=jnp.float32)

    # Finalize as soon as the last contributing block (k == t) has been accumulated.
    @pl.when(k == jnp.minimum(t, nk - 1))
    def _finalize():
        o_ref[0] = (acc_ref[...] + b_ref[...]).astype(o_ref.dtype)


def _toeplitz_stream_call(W, xp, bias_col, *, out_dtype, tt, te, vmem_limit):
    B, T_pad, E_pad = xp.shape
    assert T_pad % tt == 0 and E_pad % te == 0
    nt = T_pad // tt
    ne = E_pad // te
    nk = nt  # tk == tt, required for the block-level triangular skip
    flops = 2 * B * T_pad * T_pad * E_pad
    bytes_accessed = (xp.size * xp.dtype.itemsize
                      + W.size * W.dtype.itemsize
                      + bias_col.size * 4
                      + B * T_pad * E_pad * jnp.dtype(out_dtype).itemsize)
    return pl.pallas_call(
        _toeplitz_stream_kernel,
        out_shape=jax.ShapeDtypeStruct((B, T_pad, E_pad), out_dtype),
        grid_spec=pltpu.PrefetchScalarGridSpec(
            num_scalar_prefetch=0,
            grid=(B, nt, ne, nk),
            in_specs=[
                # Clamp k to t so skipped (zero) blocks never trigger a fresh DMA.
                pl.BlockSpec((tt, tt), lambda b, t, e, k: (t, jnp.minimum(k, t))),
                pl.BlockSpec((1, tt, te), lambda b, t, e, k: (b, jnp.minimum(k, t), e)),
                pl.BlockSpec((tt, 1), lambda b, t, e, k: (t, 0)),
            ],
            out_specs=pl.BlockSpec((1, tt, te), lambda b, t, e, k: (b, t, e)),
            scratch_shapes=[pltpu.VMEM((tt, te), jnp.float32)],
        ),
        compiler_params=pltpu.CompilerParams(
            dimension_semantics=("parallel", "parallel", "parallel", "arbitrary"),
            vmem_limit_bytes=vmem_limit,
        ),
        cost_estimate=pl.CostEstimate(flops=flops, transcendentals=0,
                                      bytes_accessed=bytes_accessed),
    )(W, xp, bias_col)


# ----------------------------- wrapper (glue) ----------------------------------
def toeplitz_forward(x, weight, bias, *, compute_dtype=jnp.bfloat16,
                     te=None, tt=512, force_stream=False):
    """x: (B, T, E) -> (B, T, E), matching PyTorch Toeplitz.forward.

    compute_dtype: dtype of the matmul operands (default bfloat16 for v6e/v7x MXU
    throughput); accumulation and the bias add are always f32, output keeps x.dtype.
    """
    B, T, E = x.shape
    if T > weight.shape[0] or T > bias.shape[0]:
        # Matches PyTorch, where T > block_size would shape-fail the matmul.
        raise ValueError(f"sequence length {T} exceeds block_size {weight.shape[0]}")

    cdt = jnp.dtype(compute_dtype)
    in_itm = x.dtype.itemsize
    out_itm = x.dtype.itemsize
    vmem_limit = _vmem_limit_bytes()
    E_pad0 = _round_up(E, 128)

    T_res = _round_up(T, 128)
    w_bytes = T_res * T_res * cdt.itemsize
    use_resident = (not force_stream) and (w_bytes <= vmem_limit // 4)

    if use_resident:
        T_pad = T_res
        if te is None:
            # te as large as the remaining VMEM budget allows (double-buffered x + out
            # tiles next to the resident W), capped at E_pad and 2048 lanes.
            per_col = 2 * T_pad * (in_itm + out_itm)
            budget = vmem_limit - w_bytes - (2 << 20)
            te_fit = max(128, (budget // per_col) // 128 * 128)
            te_sel = min(te_fit, E_pad0, 2048)
        else:
            te_sel = max(128, min(_round_up(te, 128), E_pad0))
        # v7x megacore: keep at least 2 parallel grid steps when possible.
        if B * ((E_pad0 + te_sel - 1) // te_sel) < 2 and E_pad0 >= 256:
            te_sel = max(128, _round_up(E_pad0 // 2, 128))
        E_pad = _round_up(E, te_sel)

        W = build_toeplitz_matrix_T(weight, T, T_pad).astype(cdt)
        bias_col = jnp.zeros((T_pad, 1), jnp.float32).at[:T, 0].set(
            bias[:T].astype(jnp.float32))
        xp = x
        if (T_pad, E_pad) != (T, E):
            xp = jnp.pad(x, ((0, 0), (0, T_pad - T), (0, E_pad - E)))

        out = _toeplitz_resident_call(W, xp, bias_col, out_dtype=x.dtype,
                                      te=te_sel, vmem_limit=vmem_limit)
    else:
        # Streaming fallback (W tiled along the reduction axis).
        tt_sel = max(128, min(_round_up(tt, 128), _round_up(T, 128)))
        T_pad = _round_up(T, tt_sel)
        if te is None:
            budget = vmem_limit - 4 * tt_sel * tt_sel * cdt.itemsize - (2 << 20)
            per_col = tt_sel * (2 * in_itm + 2 * out_itm + 4)
            te_fit = max(128, (budget // per_col) // 128 * 128)
            te_sel = min(te_fit, E_pad0, 2048)
        else:
            te_sel = max(128, min(_round_up(te, 128), E_pad0))
        E_pad = _round_up(E, te_sel)

        W = build_toeplitz_matrix_T(weight, T, T_pad).astype(cdt)
        bias_col = jnp.zeros((T_pad, 1), jnp.float32).at[:T, 0].set(
            bias[:T].astype(jnp.float32))
        xp = x
        if (T_pad, E_pad) != (T, E):
            xp = jnp.pad(x, ((0, 0), (0, T_pad - T), (0, E_pad - E)))

        out = _toeplitz_stream_call(W, xp, bias_col, out_dtype=x.dtype,
                                    tt=tt_sel, te=te_sel, vmem_limit=vmem_limit)

    if (T_pad, E_pad) != (T, E):
        out = out[:, :T, :E]
    return out


# ----------------------------- reference (pure JAX) ----------------------------
def toeplitz_reference(x, weight, bias, compute_dtype=None):
    B, T, E = x.shape
    cdt = jnp.dtype(compute_dtype) if compute_dtype is not None else x.dtype
    W = build_toeplitz_matrix_T(weight, T, T).astype(cdt)
    acc = jnp.einsum("ti,bie->bte", W, x.astype(cdt),
                     preferred_element_type=jnp.float32)
    acc = acc + bias[:T].astype(jnp.float32)[None, :, None]
    return acc.astype(x.dtype)


# ----------------------------------- main --------------------------------------
if __name__ == "__main__":
    # Small but tiling-realistic shapes consistent with Config (embed_dim=512,
    # block_size=512); T and E are multiples of 128 so the real lane/sublane paths run.
    B, T, E = 2, 256, 512
    block_size = 512

    key = jax.random.PRNGKey(0)
    kx, kw, kb = jax.random.split(key, 3)

    x = jax.random.normal(kx, (B, T, E), dtype=jnp.float32)
    # nn.Parameter(torch.zeros(block_size)) — deterministic nonzero init used instead so
    # the test is non-trivial (zeros would make the output identically zero).
    weight = jax.random.normal(kw, (block_size,), dtype=jnp.float32) * 0.1
    bias = jax.random.normal(kb, (block_size,), dtype=jnp.float32) * 0.1

    # 1) Default path: W resident in VMEM, bf16 operands, f32 accumulate.
    out_bf = jax.block_until_ready(toeplitz_forward(x, weight, bias))
    ref_bf = toeplitz_reference(x, weight, bias, compute_dtype=jnp.bfloat16)
    assert out_bf.shape == (B, T, E)
    assert jnp.allclose(out_bf, ref_bf, atol=1e-2, rtol=1e-2), "bf16 resident mismatch"

    # 2) Resident path with f32 operands.
    out_f32 = jax.block_until_ready(
        toeplitz_forward(x, weight, bias, compute_dtype=jnp.float32))
    ref_f32 = toeplitz_reference(x, weight, bias)
    assert jnp.allclose(out_f32, ref_f32, atol=2e-3, rtol=2e-3), "f32 resident mismatch"

    # 3) Streaming fallback, forced with small tiles so the multi-block grid
    #    (triangular skip + early finalize) path is exercised too.
    out_st = jax.block_until_ready(
        toeplitz_forward(x, weight, bias, compute_dtype=jnp.float32,
                         tt=128, te=128, force_stream=True))
    assert jnp.allclose(out_st, ref_f32, atol=2e-3, rtol=2e-3), "f32 streaming mismatch"

    # TODO(synk): the autoregressive `step()` method (incremental history einsum) is
    # inference-loop glue; only the hot forward path is implemented as Pallas kernels.
    print("KERNEL_OK")
</pallas_src>

<mosaic_0001>
module attributes {stable_mosaic.version = 11 : i64} {
  func.func @_toeplitz_resident_kernel(%arg0: i32, %arg1: i32, %arg2: memref<256x256xbf16, #tpu.memory_space<vmem>>, %arg3: memref<1x256x512xf32, #tpu.memory_space<vmem>>, %arg4: memref<256x1xf32, #tpu.memory_space<vmem>>, %arg5: memref<1x256x512xf32, #tpu.memory_space<vmem>>) attributes {dimension_semantics = [#tpu.dimension_semantics<parallel>, #tpu.dimension_semantics<parallel>], iteration_bounds = array<i64: 2, 1>, scalar_prefetch = 0 : i64, scratch_operands = 0 : i64, tpu.core_type = #tpu.core_type<tc>, window_params = [{pipeline_mode = #tpu.pipeline_mode<synchronous>, transform_indices = @transform_0, window_bounds = array<i64: 256, 256>}, {transform_indices = @transform_1, window_bounds = array<i64: 1, 256, 512>}, {pipeline_mode = #tpu.pipeline_mode<synchronous>, transform_indices = @transform_2, window_bounds = array<i64: 256, 1>}, {transform_indices = @transform_3, window_bounds = array<i64: 1, 256, 512>}]} {
    %c0 = arith.constant 0 : index
    %c0_0 = arith.constant 0 : index
    %c0_1 = arith.constant 0 : index
    %0 = vector.load %arg3[%c0, %c0_0, %c0_1] : memref<1x256x512xf32, #tpu.memory_space<vmem>>, vector<1x256x512xf32>
    %1 = vector.shape_cast %0 : vector<1x256x512xf32> to vector<256x512xf32>
    %2 = arith.truncf %1 : vector<256x512xf32> to vector<256x512xbf16>
    %c0_2 = arith.constant 0 : index
    %c0_3 = arith.constant 0 : index
    %3 = vector.load %arg2[%c0_2, %c0_3] : memref<256x256xbf16, #tpu.memory_space<vmem>>, vector<256x256xbf16>
    %cst = arith.constant dense<0.000000e+00> : vector<256x512xf32>
    %4 = tpu.matmul %3, %2, %cst {dimension_numbers = #tpu.dot_dimension_numbers<[1], [0], [0], [1], [0, 0, 1, 1], [], []>} : vector<256x256xbf16>, vector<256x512xbf16>, vector<256x512xf32> -> vector<256x512xf32>
    %c0_4 = arith.constant 0 : index
    %c0_5 = arith.constant 0 : index
    %5 = vector.load %arg4[%c0_4, %c0_5] : memref<256x1xf32, #tpu.memory_space<vmem>>, vector<256x1xf32>
    %6 = vector.broadcast %5 : vector<256x1xf32> to vector<256x512xf32>
    %7 = arith.addf %4, %6 : vector<256x512xf32>
    %c0_6 = arith.constant 0 : index
    %c0_7 = arith.constant 0 : index
    %c0_8 = arith.constant 0 : index
    %8 = vector.load %arg5[%c0_6, %c0_7, %c0_8] : memref<1x256x512xf32, #tpu.memory_space<vmem>>, vector<1x256x512xf32>
    %9 = vector.shape_cast %8 : vector<1x256x512xf32> to vector<256x512xf32>
    %10 = vector.shape_cast %7 : vector<256x512xf32> to vector<1x256x512xf32>
    tpu.vector_store %arg5[%c0_6, %c0_7, %c0_8], %10 {strides = array<i32>} : memref<1x256x512xf32, #tpu.memory_space<vmem>>, vector<1x256x512xf32>,
    return
  }
  func.func @transform_0(%arg0: i32, %arg1: i32) -> (i32, i32) {
    %c0_i32 = arith.constant 0 : i32
    %c0_i32_0 = arith.constant 0 : i32
    %c0_i32_1 = arith.constant 0 : i32
    return %c0_i32, %c0_i32_0 : i32, i32
  }
  func.func @transform_1(%arg0: i32, %arg1: i32) -> (i32, i32, i32) {
    %c0_i32 = arith.constant 0 : i32
    %c0_i32_0 = arith.constant 0 : i32
    return %arg0, %c0_i32, %arg1 : i32, i32, i32
  }
  func.func @transform_2(%arg0: i32, %arg1: i32) -> (i32, i32) {
    %c0_i32 = arith.constant 0 : i32
    %c0_i32_0 = arith.constant 0 : i32
    %c0_i32_1 = arith.constant 0 : i32
    return %c0_i32, %c0_i32_0 : i32, i32
  }
  func.func @transform_3(%arg0: i32, %arg1: i32) -> (i32, i32, i32) {
    %c0_i32 = arith.constant 0 : i32
    %c0_i32_0 = arith.constant 0 : i32
    return %arg0, %c0_i32, %arg1 : i32, i32, i32
  }
}

</mosaic_0001>

<bundles_post_ra>
// kernel: tpu_custom_call.1
= control target key start
LH: loop header
LB: loop body
LE: loop exit
PB: predicated region body
PF: predicated region fallthrough
CT: control target
= control target key end

     0   :  { %8 = vsyncpa [#allocation3], 0  ;;  %s2308_s0 = inlined_call_operand.vmem [shape: bf16[256,256], index: 0, kind: input, shape index: {}]   ;;  %s2309_s1 = inlined_call_operand.hbm [shape: f32[2,256,512], index: 1, kind: input, shape index: {}]   ;;  %s2310_s2 = inlined_call_operand.vmem [shape: f32[256,1], index: 2, kind: input, shape index: {}]   ;;  %s2311_s3 = inlined_call_operand.hbm [shape: f32[2,256,512], index: 3, kind: output, shape index: {}]  }
   0x1   :  { %10 = vsyncpa [#allocation3 + $0x1], 0 }
   0x2   :  { %11 = vsyncpa [#allocation4], 0 }
   0x3   :  { %13 = vsyncpa [#allocation4 + $0x1], 0  ;;  %s1705_s12 = smov 0   ;;  %s1707_s13 = smov 0  }
   0x4   :  { %s1709_s14 = smov 0   ;;  %s1711_s15 = smov 0  }
   0x5   :  { %s1713_s16 = smov 0   ;;  %s1715_s17 = smov 0  }
   0x6 LB: > { %s1402_s18 = sadd.s32 4294967295, %s1676_s17   ;;  %s1403_s19 = sadd.s32 4294967294, %s1676_s17   ;;  %s1676_s17 = sphi %s1715_s17, %s19_s17   ;;  %s1672_s16 = sphi %s1713_s16, %s2322_s16   ;;  %s1668_s15 = sphi %s1711_s15, %s2321_s15   ;;  %s1664_s14 = sphi %s1709_s14, %s2320_s14   ;;  %s1660_s13 = sphi %s1707_s13, %s2319_s13   ;;  %s1656_s12 = sphi %s1705_s12, %s2318_s12  }
   0x7   : > { %s31_s20 = sadd.s32 1, %s1672_s16  ;;  %s61_s21 = sadd.s32 1, %s1664_s14 }
   0x8   : > { %p33_p0 = scmp.ge.s32.totalorder %s31_s20, 2  ;;  %p68_p1 = scmp.ne.s32.totalorder %s1664_s14, %s1660_s13 }
   0x9   : > { %p69_p2 = scmp.eq.s32.totalorder %s1676_s17, 0  ;;  %p74_p3 = scmp.ne.s32.totalorder %s1660_s13, %s1656_s12 }
   0xa   : > { %s2324_s20 = smov (%p33_p0, %s31_s20), 0  ;;  %p75_p5 = scmp.eq.s32.totalorder %s1402_s18, 0 }
   0xb   : > { %p1746_p4 = por %p69_p2, %p68_p1  ;;  %s56_s23 = ssub.s32 %s1672_s16, %s2324_s20 }
   0xc   : > { %p121_p6 = scmp.eq.s32.totalorder %s1402_s18, 1  ;;  %p59_p7 = scmp.eq.s32.totalorder %s56_s23, 0 }
   0xd   : > { %p1752_p8 = por %p75_p5, %p74_p3  ;;  %p127_p10 = scmp.eq.s32.totalorder %s1403_s19, 1 }
   0xe   : > { %p1756_p9 = por %p121_p6, %p68_p1  ;;  %p1463_p13 = scmp.lt.s32.totalorder %s1676_s17, 2 }
   0xf   : > { %s1761_s26 = scalar_select %p59_p7, %s1664_s14, %s61_s21  }
  0x10   : > { %p1763_p11 = por %p127_p10, %p74_p3  ;;  %s153_s28 = sand.u32 1, %s1664_s14  }
  0x11   : > { %s1406_s29 = sshll.u32 %s153_s28, 10  ;;  %s1449_s30 = sshll.u32 %s1672_s16, 14 }
  0x12   : > { %s165_s6 = scalar_lea.hbm %s2309_s1, %s1449_s30  ;;  %s157_s7 = scalar_lea.vmem [#allocation2], %s1406_s29 }
  0x13   : > { %s166_s8 = sshll.u32 %s157_s7, 4  ;;  %p1776_p0 = pnand %p1463_p13, %p1746_p4  ;;  %s167_s8 = int_to_ptr.vmem [resolvable:$true] %s166_s8 }
  0x14   : > { %p1409_p1 = scmp.ge.s32.totalorder %s1676_s17, 1  ;;  %s154_s10 = scalar_lea.sflag [#allocation3], %s153_s28 }
  0x15   : > { %p1570_p2 = pneg %p1776_p0  ;;  %s1581_s11 = scalar_lea.vmem %s167_s8, 16384 }
  0x16   : > { %p1582_p3 = scmp.ne.s32.totalorder %s167_s8, %s1581_s11  ;;  %s1678_s18 = smov [#allocation2]  }
  0x17   : > { %s1586_s19 = sshll.u32 %s1678_s18, 4  ;;  %s1587_s19 = int_to_ptr.vmem [resolvable:$false] %s1586_s19 }
  0x18   : > { %p1584_p5 = pnand %p1582_p3, %p1570_p2  ;;  %s1588_s21 = scalar_lea.vmem %s1587_s19, 32768 }
  0x19   : > { %p1589_p7 = scmp.lt.s32.totalorder %s167_s8, %s1587_s19  ;;  %p1590_p10 = scmp.lt.s32.totalorder %s1588_s21, %s1581_s11 }
  0x1a   : > { %p1585_p6 = pneg %p1584_p5 }
  0x1b   : > { %p1591_p12 = por %p1590_p10, %p1589_p7 }
  0x1d   : > { %p1592_p4 = pnand %p1591_p12, %p1585_p6 }
  0x1f   : > { %1595 = shalt.err (!%p1592_p4)
}
  0x20   : > { %s1679_s22 = smov 512   ;;  %s1680_s23 = smov 32  }
  0x21   : > { %1458 = dma.hbm_to_vmem [thread:$0]  (!%p1776_p0), %s165_s6, 16384, %s167_s8, %s154_s10, %s1679_s22, %s1679_s22, %s1680_s23  }
  0x22   : > { %p174_p13 = scmp.lt.s32.totalorder %s1676_s17, 3 }
  0x24   : > { %p175_p2 = pnand %p1409_p1, %p174_p13 }
  0x25   : > { %s1789_s28 = sand.u32 (!%p175_p2), 1, %s1660_s13  }
  0x26   : > { %178 = sbr.rel (%p175_p2) target bundleno = 448 (0x1c0), region = 32  ;;  %s1410_s29 = sshll.u32 (!%p175_p2), %s1789_s28, 10 }
  0x27   : > { %s181_s30 = scalar_lea.sflag (!%p175_p2), [#allocation3], %s1789_s28  ;;  %s1795_s4 = scalar_lea.vmem (!%p175_p2), [#allocation2], %s1410_s29 }
  0x2b   : > { %1647 = dma.done.wait (%p1752_p8), %s181_s30, 16384  }
  0x2c   : > { %1649 = vsyncadd (%p1752_p8), %s181_s30, 4294950912  ;;  %v266_v0 = vld [vmem:[%s1795_s4 + $0x1c8] sm:$0xff]  ;;  %v268_v2 = vld [vmem:[%s1795_s4 + $0x1d8] sm:$0xff]  ;;  %v1681_v25 = vmov 0   ;;  %s2123_s18 = scalar_lea.vmem [#allocation5], %s1410_s29  ;;  %s1450_s29 = sshll.u32 %s1668_s15, 14 }
  0x2d   : > { %v270_v1 = vld [vmem:[%s1795_s4 + $0x1e8] sm:$0xff]  ;;  %v272_v4 = vld [vmem:[%s1795_s4 + $0x1f8] sm:$0xff]  ;;  %v265_v5 = vld [vmem:[%s1795_s4 + $0x1c0] sm:$0xff]  ;;  %1518 = vset.pattern.permute.xlu0 %v1681_v25  ;;  %1519 = vset.pattern.permute.xlu1 %v1681_v25  ;;  %s1315_s19 = sshll.u32 %s2123_s18, 4  ;;  %s2255_s23 = scalar_lea.hbm %s2311_s3, %s1450_s29  ;;  %s2257_s19 = int_to_ptr.vmem [resolvable:$true] %s1315_s19 }
  0x2e   : > { %v366_v3 = vpack.c.bf16 %v270_v1, %v266_v0  ;;  %v269_v6 = vld [vmem:[%s1795_s4 + $0x1e0] sm:$0xff]  ;;  %v368_v7 = vpack.c.bf16 %v272_v4, %v268_v2  ;;  %v267_v9 = vld [vmem:[%s1795_s4 + $0x1d0] sm:$0xff]  ;;  %v258_v11 = vld [vmem:[%s1795_s4 + $0x188] sm:$0xff]  ;;  %s1300_s15 = scalar_lea.sflag [#allocation4], %s1789_s28  ;;  %s1596_s30 = scalar_lea.vmem %s2257_s19, 16384 }
  0x2f   : > { %v365_v8 = vpack.c.bf16 %v269_v6, %v265_v5  ;;  %v271_v10 = vld [vmem:[%s1795_s4 + $0x1f0] sm:$0xff]  ;;  %v262_v13 = vld [vmem:[%s1795_s4 + $0x1a8] sm:$0xff]  ;;  %v260_v14 = vld [vmem:[%s1795_s4 + $0x198] sm:$0xff]  ;;  %p1597_p8 = scmp.ne.s32.totalorder %s2257_s19, %s1596_s30 }
  0x30   : > { %785 = vmatprep.subr.bf16.mxu0 %v366_v3  ;;  %v367_v12 = vpack.c.bf16 %v271_v10, %v267_v9  ;;  %v264_v15 = vld [vmem:[%s1795_s4 + $0x1b8] sm:$0xff]  ;;  %978 = vmatprep.subr.bf16.mxu1 %v368_v7  ;;  %v362_v16 = vpack.c.bf16 %v262_v13, %v258_v11  ;;  %v257_v18 = vld [vmem:[%s1795_s4 + $0x180] sm:$0xff]  ;;  %v259_v20 = vld [vmem:[%s1795_s4 + $0x190] sm:$0xff] }
  0x31   : > { %786 = vmatpush1.bf16.msra.mxu0 %v365_v8  ;;  %v364_v17 = vpack.c.bf16 %v264_v15, %v260_v14  ;;  %v261_v19 = vld [vmem:[%s1795_s4 + $0x1a0] sm:$0xff]  ;;  %v263_v22 = vld [vmem:[%s1795_s4 + $0x1b0] sm:$0xff]  ;;  %v250_v23 = vld [vmem:[%s1795_s4 + $0x148] sm:$0xff]  ;;  %p1598_p12 = pnand %p1597_p8, %p1756_p9 }
  0x32   : > { %979 = vmatpush1.bf16.msra.mxu1 %v367_v12  ;;  %v361_v21 = vpack.c.bf16 %v261_v19, %v257_v18  ;;  %v254_v24 = vld [vmem:[%s1795_s4 + $0x168] sm:$0xff]  ;;  %787 = vmatprep.subr.bf16.mxu0 %v362_v16  ;;  %v363_v26 = vpack.c.bf16 %v263_v22, %v259_v20  ;;  %v252_v28 = vld [vmem:[%s1795_s4 + $0x158] sm:$0xff]  ;;  %v249_v30 = vld [vmem:[%s1795_s4 + $0x140] sm:$0xff] }
  0x33   : > { %980 = vmatprep.subr.bf16.mxu1 %v364_v17  ;;  %v358_v27 = vpack.c.bf16 %v254_v24, %v250_v23  ;;  %v256_v29 = vld [vmem:[%s1795_s4 + $0x178] sm:$0xff]  ;;  %v253_v32 = vld [vmem:[%s1795_s4 + $0x160] sm:$0xff]  ;;  %v251_v33 = vld [vmem:[%s1795_s4 + $0x150] sm:$0xff]  ;;  %p1599_p0 = pneg %p1598_p12 }
  0x34   : > { %v360_v31 = vpack.c.bf16 %v256_v29, %v252_v28  ;;  %v255_v34 = vld [vmem:[%s1795_s4 + $0x170] sm:$0xff]  ;;  %v357_v35 = vpack.c.bf16 %v253_v32, %v249_v30  ;;  %v242_v36 = vld [vmem:[%s1795_s4 + $0x108] sm:$0xff]  ;;  %v244_v38 = vld [vmem:[%s1795_s4 + $0x118] sm:$0xff] }
  0x35   : > { %788 = vmatpush1.bf16.msra.mxu0 %v361_v21  ;;  %v246_v37 = vld [vmem:[%s1795_s4 + $0x128] sm:$0xff]  ;;  %v359_v39 = vpack.c.bf16 %v255_v34, %v251_v33  ;;  %v248_v41 = vld [vmem:[%s1795_s4 + $0x138] sm:$0xff]  ;;  %v241_v42 = vld [vmem:[%s1795_s4 + $0x100] sm:$0xff] }
  0x36   : > { %981 = vmatpush1.bf16.msra.mxu1 %v363_v26  ;;  %789 = vmatprep.subr.bf16.mxu0 %v358_v27  ;;  %v354_v40 = vpack.c.bf16 %v246_v37, %v242_v36  ;;  %v245_v43 = vld [vmem:[%s1795_s4 + $0x120] sm:$0xff]  ;;  %v356_v44 = vpack.c.bf16 %v248_v41, %v244_v38  ;;  %v243_v45 = vld [vmem:[%s1795_s4 + $0x110] sm:$0xff]  ;;  %v234_v47 = vld [vmem:[%s1795_s4 + $0xc8] sm:$0xff] }
  0x37   : > { %982 = vmatprep.subr.bf16.mxu1 %v360_v31  ;;  %v247_v46 = vld [vmem:[%s1795_s4 + $0x130] sm:$0xff]  ;;  %v238_v48 = vld [vmem:[%s1795_s4 + $0xe8] sm:$0xff]  ;;  %v236_v49 = vld [vmem:[%s1795_s4 + $0xd8] sm:$0xff]  ;;  %v353_v51 = vpack.c.bf16 %v245_v43, %v241_v42 }
  0x38   : > { %v240_v50 = vld [vmem:[%s1795_s4 + $0xf8] sm:$0xff]  ;;  %v355_v52 = vpack.c.bf16 %v247_v46, %v243_v45  ;;  %v350_v53 = vpack.c.bf16 %v238_v48, %v234_v47  ;;  %v233_v54 = vld [vmem:[%s1795_s4 + $0xc0] sm:$0xff]  ;;  %v235_v56 = vld [vmem:[%s1795_s4 + $0xd0] sm:$0xff] }
  0x39   : > { %790 = vmatpush1.bf16.msra.mxu0 %v357_v35  ;;  %v237_v55 = vld [vmem:[%s1795_s4 + $0xe0] sm:$0xff]  ;;  %v352_v57 = vpack.c.bf16 %v240_v50, %v236_v49  ;;  %v239_v58 = vld [vmem:[%s1795_s4 + $0xf0] sm:$0xff]  ;;  %v226_v59 = vld [vmem:[%s1795_s4 + $0x88] sm:$0xff] }
  0x3a   : > { %983 = vmatpush1.bf16.msra.mxu1 %v359_v39  ;;  %791 = vmatprep.subr.bf16.mxu0 %v354_v40  ;;  %v230_v60 = vld [vmem:[%s1795_s4 + $0xa8] sm:$0xff]  ;;  %v228_v61 = vld [vmem:[%s1795_s4 + $0x98] sm:$0xff]  ;;  %v349_v63 = vpack.c.bf16 %v237_v55, %v233_v54  ;;  %v351_v0 = vpack.c.bf16 %v239_v58, %v235_v56  ;;  %v225_v2 = vld [vmem:[%s1795_s4 + $0x80] sm:$0xff] }
  0x3b   : > { %984 = vmatprep.subr.bf16.mxu1 %v356_v44  ;;  %v232_v62 = vld [vmem:[%s1795_s4 + $0xb8] sm:$0xff]  ;;  %v346_v1 = vpack.c.bf16 %v230_v60, %v226_v59  ;;  %v229_v3 = vld [vmem:[%s1795_s4 + $0xa0] sm:$0xff]  ;;  %v227_v4 = vld [vmem:[%s1795_s4 + $0x90] sm:$0xff] }
  0x3c   : > { %v348_v5 = vpack.c.bf16 %v232_v62, %v228_v61  ;;  %v231_v6 = vld [vmem:[%s1795_s4 + $0xb0] sm:$0xff]  ;;  %v218_v7 = vld [vmem:[%s1795_s4 + $0x48] sm:$0xff]  ;;  %v220_v9 = vld [vmem:[%s1795_s4 + $0x58] sm:$0xff]  ;;  %v345_v11 = vpack.c.bf16 %v229_v3, %v225_v2 }
  0x3d   : > { %792 = vmatpush1.bf16.msra.mxu0 %v353_v51  ;;  %v222_v8 = vld [vmem:[%s1795_s4 + $0x68] sm:$0xff]  ;;  %v224_v10 = vld [vmem:[%s1795_s4 + $0x78] sm:$0xff]  ;;  %v347_v12 = vpack.c.bf16 %v231_v6, %v227_v4  ;;  %v217_v14 = vld [vmem:[%s1795_s4 + $0x40] sm:$0xff] }
  0x3e   : > { %985 = vmatpush1.bf16.msra.mxu1 %v355_v52  ;;  %793 = vmatprep.subr.bf16.mxu0 %v350_v53  ;;  %v342_v13 = vpack.c.bf16 %v222_v8, %v218_v7  ;;  %v221_v15 = vld [vmem:[%s1795_s4 + $0x60] sm:$0xff]  ;;  %v219_v16 = vld [vmem:[%s1795_s4 + $0x50] sm:$0xff]  ;;  %v344_v17 = vpack.c.bf16 %v224_v10, %v220_v9  ;;  %v210_v19 = vld [vmem:[%s1795_s4 + $0x8] sm:$0xff] }
  0x3f   : > { %986 = vmatprep.subr.bf16.mxu1 %v352_v57  ;;  %v223_v18 = vld [vmem:[%s1795_s4 + $0x70] sm:$0xff]  ;;  %v214_v20 = vld [vmem:[%s1795_s4 + $0x28] sm:$0xff]  ;;  %v212_v21 = vld [vmem:[%s1795_s4 + $0x18] sm:$0xff]  ;;  %v341_v23 = vpack.c.bf16 %v221_v15, %v217_v14 }
  0x40   : > { %v216_v22 = vld [vmem:[%s1795_s4 + $0x38] sm:$0xff]  ;;  %v343_v24 = vpack.c.bf16 %v223_v18, %v219_v16  ;;  %v338_v25 = vpack.c.bf16 %v214_v20, %v210_v19  ;;  %v209_v26 = vld [vmem:[%s1795_s4] sm:$0xff]  ;;  %v211_v28 = vld [vmem:[%s1795_s4 + $0x10] sm:$0xff] }
  0x41   : > { %794 = vmatpush1.bf16.msra.mxu0 %v349_v63  ;;  %v213_v27 = vld [vmem:[%s1795_s4 + $0x20] sm:$0xff]  ;;  %v340_v29 = vpack.c.bf16 %v216_v22, %v212_v21  ;;  %v215_v30 = vld [vmem:[%s1795_s4 + $0x30] sm:$0xff]  ;;  %v330_v31 = vld [vmem:[%s1795_s4 + $0x3c8] sm:$0xff] }
  0x42   : > { %987 = vmatpush1.bf16.msra.mxu1 %v351_v0  ;;  %795 = vmatprep.subr.bf16.mxu0 %v346_v1  ;;  %v334_v32 = vld [vmem:[%s1795_s4 + $0x3e8] sm:$0xff]  ;;  %v332_v33 = vld [vmem:[%s1795_s4 + $0x3d8] sm:$0xff]  ;;  %v337_v35 = vpack.c.bf16 %v213_v27, %v209_v26  ;;  %v339_v36 = vpack.c.bf16 %v215_v30, %v211_v28  ;;  %v329_v38 = vld [vmem:[%s1795_s4 + $0x3c0] sm:$0xff] }
  0x43   : > { %988 = vmatprep.subr.bf16.mxu1 %v348_v5  ;;  %v336_v34 = vld [vmem:[%s1795_s4 + $0x3f8] sm:$0xff]  ;;  %v398_v37 = vpack.c.bf16 %v334_v32, %v330_v31  ;;  %v333_v39 = vld [vmem:[%s1795_s4 + $0x3e0] sm:$0xff]  ;;  %v331_v40 = vld [vmem:[%s1795_s4 + $0x3d0] sm:$0xff] }
  0x44   : > { %v400_v41 = vpack.c.bf16 %v336_v34, %v332_v33  ;;  %v335_v42 = vld [vmem:[%s1795_s4 + $0x3f0] sm:$0xff]  ;;  %v322_v43 = vld [vmem:[%s1795_s4 + $0x388] sm:$0xff]  ;;  %v324_v45 = vld [vmem:[%s1795_s4 + $0x398] sm:$0xff]  ;;  %v397_v47 = vpack.c.bf16 %v333_v39, %v329_v38 }
  0x45   : > { %796 = vmatpush1.bf16.msra.mxu0 %v345_v11  ;;  %v326_v44 = vld [vmem:[%s1795_s4 + $0x3a8] sm:$0xff]  ;;  %v328_v46 = vld [vmem:[%s1795_s4 + $0x3b8] sm:$0xff]  ;;  %v399_v48 = vpack.c.bf16 %v335_v42, %v331_v40  ;;  %v321_v50 = vld [vmem:[%s1795_s4 + $0x380] sm:$0xff] }
  0x46   : > { %989 = vmatpush1.bf16.msra.mxu1 %v347_v12  ;;  %797 = vmatprep.subr.bf16.mxu0 %v342_v13  ;;  %v394_v49 = vpack.c.bf16 %v326_v44, %v322_v43  ;;  %v325_v51 = vld [vmem:[%s1795_s4 + $0x3a0] sm:$0xff]  ;;  %v323_v52 = vld [vmem:[%s1795_s4 + $0x390] sm:$0xff]  ;;  %v396_v53 = vpack.c.bf16 %v328_v46, %v324_v45  ;;  %v314_v55 = vld [vmem:[%s1795_s4 + $0x348] sm:$0xff] }
  0x47   : > { %990 = vmatprep.subr.bf16.mxu1 %v344_v17  ;;  %v327_v54 = vld [vmem:[%s1795_s4 + $0x3b0] sm:$0xff]  ;;  %v318_v56 = vld [vmem:[%s1795_s4 + $0x368] sm:$0xff]  ;;  %v316_v57 = vld [vmem:[%s1795_s4 + $0x358] sm:$0xff]  ;;  %v393_v59 = vpack.c.bf16 %v325_v51, %v321_v50 }
  0x48   : > { %v320_v58 = vld [vmem:[%s1795_s4 + $0x378] sm:$0xff]  ;;  %v395_v60 = vpack.c.bf16 %v327_v54, %v323_v52  ;;  %v390_v61 = vpack.c.bf16 %v318_v56, %v314_v55  ;;  %v313_v62 = vld [vmem:[%s1795_s4 + $0x340] sm:$0xff]  ;;  %v315_v0 = vld [vmem:[%s1795_s4 + $0x350] sm:$0xff] }
  0x49   : > { %798 = vmatpush1.bf16.msra.mxu0 %v341_v23  ;;  %v317_v63 = vld [vmem:[%s1795_s4 + $0x360] sm:$0xff]  ;;  %v392_v1 = vpack.c.bf16 %v320_v58, %v316_v57  ;;  %v319_v2 = vld [vmem:[%s1795_s4 + $0x370] sm:$0xff]  ;;  %v306_v3 = vld [vmem:[%s1795_s4 + $0x308] sm:$0xff] }
  0x4a   : > { %991 = vmatpush1.bf16.msra.mxu1 %v343_v24  ;;  %799 = vmatprep.subr.bf16.mxu0 %v338_v25  ;;  %v310_v4 = vld [vmem:[%s1795_s4 + $0x328] sm:$0xff]  ;;  %v308_v5 = vld [vmem:[%s1795_s4 + $0x318] sm:$0xff]  ;;  %v389_v7 = vpack.c.bf16 %v317_v63, %v313_v62  ;;  %v305_v8 = vld [vmem:[%s1795_s4 + $0x300] sm:$0xff]  ;;  %v391_v11 = vpack.c.bf16 %v319_v2, %v315_v0 }
  0x4b   : > { %992 = vmatprep.subr.bf16.mxu1 %v340_v29  ;;  %v312_v6 = vld [vmem:[%s1795_s4 + $0x338] sm:$0xff]  ;;  %v309_v9 = vld [vmem:[%s1795_s4 + $0x320] sm:$0xff]  ;;  %v307_v10 = vld [vmem:[%s1795_s4 + $0x310] sm:$0xff]  ;;  %v386_v12 = vpack.c.bf16 %v310_v4, %v306_v3 }
  0x4c   : > { %v311_v13 = vld [vmem:[%s1795_s4 + $0x330] sm:$0xff]  ;;  %v298_v14 = vld [vmem:[%s1795_s4 + $0x2c8] sm:$0xff]  ;;  %v388_v16 = vpack.c.bf16 %v312_v6, %v308_v5  ;;  %v300_v17 = vld [vmem:[%s1795_s4 + $0x2d8] sm:$0xff]  ;;  %v385_v22 = vpack.c.bf16 %v309_v9, %v305_v8 }
  0x4d   : > { %800 = vmatpush1.bf16.msra.mxu0 %v337_v35  ;;  %v302_v15 = vld [vmem:[%s1795_s4 + $0x2e8] sm:$0xff]  ;;  %v304_v18 = vld [vmem:[%s1795_s4 + $0x2f8] sm:$0xff]  ;;  %v297_v19 = vld [vmem:[%s1795_s4 + $0x2c0] sm:$0xff]  ;;  %v387_v26 = vpack.c.bf16 %v311_v13, %v307_v10 }
  0x4e   : > { %993 = vmatpush1.bf16.msra.mxu1 %v339_v36  ;;  %801 = vmatprep.subr.bf16.mxu0 %v398_v37  ;;  %v301_v20 = vld [vmem:[%s1795_s4 + $0x2e0] sm:$0xff]  ;;  %v299_v23 = vld [vmem:[%s1795_s4 + $0x2d0] sm:$0xff]  ;;  %v290_v25 = vld [vmem:[%s1795_s4 + $0x288] sm:$0xff]  ;;  %v382_v27 = vpack.c.bf16 %v302_v15, %v298_v14  ;;  %v384_v29 = vpack.c.bf16 %v304_v18, %v300_v17 }
  0x4f   : > { %994 = vmatprep.subr.bf16.mxu1 %v400_v41  ;;  %v1522_v21 = vld [vmem:[%s2308_s0 + $0x4] ss:$8 sps:$4 sm:$0xff]   ;;  %v303_v24 = vld [vmem:[%s1795_s4 + $0x2f0] sm:$0xff]  ;;  %v292_v30 = vld [vmem:[%s1795_s4 + $0x298] sm:$0xff]  ;;  %v381_v34 = vpack.c.bf16 %v301_v20, %v297_v19 }
  0x50   : > { %v294_v28 = vld [vmem:[%s1795_s4 + $0x2a8] sm:$0xff]  ;;  %v296_v31 = vld [vmem:[%s1795_s4 + $0x2b8] sm:$0xff]  ;;  %817 = vmatprep.mubr.bf16.mxu0 %v1522_v21  ;;  %v289_v32 = vld [vmem:[%s1795_s4 + $0x280] sm:$0xff]  ;;  %1010 = vmatprep.mubr.bf16.mxu1 %v1522_v21  ;;  %v383_v38 = vpack.c.bf16 %v303_v24, %v299_v23 }
  0x51   : > { %802 = vmatpush2.bf16.msra.mxu0 %v397_v47  ;;  %v293_v33 = vld [vmem:[%s1795_s4 + $0x2a0] sm:$0xff]  ;;  %v291_v35 = vld [vmem:[%s1795_s4 + $0x290] sm:$0xff]  ;;  %v282_v37 = vld [vmem:[%s1795_s4 + $0x248] sm:$0xff]  ;;  %v378_v39 = vpack.c.bf16 %v294_v28, %v290_v25  ;;  %v380_v41 = vpack.c.bf16 %v296_v31, %v292_v30 }
  0x52   : > { %995 = vmatpush2.bf16.msra.mxu1 %v399_v48  ;;  %803 = vmatprep.subr.bf16.mxu0 %v394_v49  ;;  %v295_v36 = vld [vmem:[%s1795_s4 + $0x2b0] sm:$0xff]  ;;  %v286_v40 = vld [vmem:[%s1795_s4 + $0x268] sm:$0xff]  ;;  %v284_v42 = vld [vmem:[%s1795_s4 + $0x258] sm:$0xff]  ;;  %v377_v46 = vpack.c.bf16 %v293_v33, %v289_v32 }
  0x53   : > { %996 = vmatprep.subr.bf16.mxu1 %v396_v53  ;;  %v288_v43 = vld [vmem:[%s1795_s4 + $0x278] sm:$0xff]  ;;  %v281_v44 = vld [vmem:[%s1795_s4 + $0x240] sm:$0xff]  ;;  %v283_v47 = vld [vmem:[%s1795_s4 + $0x250] sm:$0xff]  ;;  %v379_v49 = vpack.c.bf16 %v295_v36, %v291_v35  ;;  %v374_v50 = vpack.c.bf16 %v286_v40, %v282_v37 }
  0x54   : > { %v285_v45 = vld [vmem:[%s1795_s4 + $0x260] sm:$0xff]  ;;  %v287_v48 = vld [vmem:[%s1795_s4 + $0x270] sm:$0xff]  ;;  %v274_v51 = vld [vmem:[%s1795_s4 + $0x208] sm:$0xff]  ;;  %v376_v52 = vpack.c.bf16 %v288_v43, %v284_v42 }
  0x55   : > { %804 = vmatpush2.bf16.msra.mxu0 %v393_v59  ;;  %v278_v53 = vld [vmem:[%s1795_s4 + $0x228] sm:$0xff]  ;;  %v276_v54 = vld [vmem:[%s1795_s4 + $0x218] sm:$0xff]  ;;  %v433_v55 = vld [vmem:[%s2310_s2] sm:$0xff]  ;;  %v373_v57 = vpack.c.bf16 %v285_v45, %v281_v44 }
  0x56   : > { %997 = vmatpush2.bf16.msra.mxu1 %v395_v60  ;;  %805 = vmatprep.subr.bf16.mxu0 %v390_v61  ;;  %v280_v56 = vld [vmem:[%s1795_s4 + $0x238] sm:$0xff]  ;;  %v273_v58 = vld [vmem:[%s1795_s4 + $0x200] sm:$0xff]  ;;  %v434_v59 = vld [vmem:[%s2310_s2 + $0x8] sm:$0xff]  ;;  %v375_v61 = vpack.c.bf16 %v287_v48, %v283_v47  ;;  %v370_v62 = vpack.c.bf16 %v278_v53, %v274_v51 }
  0x57   : > { %998 = vmatprep.subr.bf16.mxu1 %v392_v1  ;;  %467 = vperm.xlu0 %1518, %v433_v55   ;;  %v435_v60 = vld [vmem:[%s2310_s2 + $0x10] sm:$0xff]  ;;  %v277_v63 = vld [vmem:[%s1795_s4 + $0x220] sm:$0xff]  ;;  %v372_v0 = vpack.c.bf16 %v280_v56, %v276_v54  ;;  %v436_v3 = vld [vmem:[%s2310_s2 + $0x18] sm:$0xff] }
  0x58   : > { %v275_v1 = vld [vmem:[%s1795_s4 + $0x210] sm:$0xff]  ;;  %477 = vperm.xlu1 %1519, %v435_v60   ;;  %v369_v4 = vpack.c.bf16 %v277_v63, %v273_v58  ;;  %v437_v5 = vld [vmem:[%s2310_s2 + $0x20] sm:$0xff]  ;;  %v438_v8 = vld [vmem:[%s2310_s2 + $0x28] sm:$0xff] }
  0x59   : > { %806 = vmatpush2.bf16.msra.mxu0 %v389_v7  ;;  %v279_v2 = vld [vmem:[%s1795_s4 + $0x230] sm:$0xff]  ;;  %v1520_v7 = vld [vmem:[%s2308_s0] ss:$8 sps:$4 sm:$0xff]   ;;  %v1526_v15 = vld [vmem:[%s2308_s0 + $0x24] ss:$8 sps:$4 sm:$0xff]   ;;  %s1682_s4 = smov [#allocation5]  }
  0x5a   : > { %999 = vmatpush2.bf16.msra.mxu1 %v391_v11  ;;  %807 = vmatprep.subr.bf16.mxu0 %v386_v12  ;;  %v371_v6 = vpack.c.bf16 %v279_v2, %v275_v1  ;;  %v1523_v9 = vld [vmem:[%s2308_s0 + $0x14] ss:$8 sps:$4 sm:$0xff]   ;;  %v441_v12 = vld [vmem:[%s2310_s2 + $0x40] sm:$0xff]  ;;  %v1525_v13 = vld [vmem:[%s2308_s0 + $0x10] ss:$8 sps:$4 sm:$0xff]   ;;  %s1600_s24 = sshll.u32 %s1682_s4, 4  ;;  %s1601_s24 = int_to_ptr.vmem [resolvable:$false] %s1600_s24 }
  0x5b   : > { %1000 = vmatprep.subr.bf16.mxu1 %v388_v16  ;;  %472 = vperm.xlu0 %1518, %v434_v59   ;;  %v439_v10 = vld [vmem:[%s2310_s2 + $0x30] sm:$0xff]  ;;  %v440_v11 = vld [vmem:[%s2310_s2 + $0x38] sm:$0xff]  ;;  %v442_v14 = vld [vmem:[%s2310_s2 + $0x48] sm:$0xff]  ;;  %s1602_s5 = scalar_lea.vmem %s1601_s24, 32768  ;;  %p1603_p1 = scmp.lt.s32.totalorder %s2257_s19, %s1601_s24 }
  0x5c   : > { %482 = vperm.xlu1 %1519, %v436_v3   ;;  %v443_v16 = vld [vmem:[%s2310_s2 + $0x50] sm:$0xff]  ;;  %v444_v17 = vld [vmem:[%s2310_s2 + $0x58] sm:$0xff]  ;;  %v445_v18 = vld [vmem:[%s2310_s2 + $0x60] sm:$0xff]  ;;  %p1604_p3 = scmp.lt.s32.totalorder %s1602_s5, %s1596_s30 }
  0x5d   : > { %808 = vmatpush2.bf16.msra.mxu0 %v385_v22  ;;  %v1528_v19 = vld [vmem:[%s2308_s0 + $0x20] ss:$8 sps:$4 sm:$0xff]   ;;  %v1529_v21 = vld [vmem:[%s2308_s0 + $0x34] ss:$8 sps:$4 sm:$0xff]   ;;  %v1531_v25 = vld [vmem:[%s2308_s0 + $0x30] ss:$8 sps:$4 sm:$0xff]  }
  0x5e   : > { %1001 = vmatpush2.bf16.msra.mxu1 %v387_v26  ;;  %809 = vmatprep.subr.bf16.mxu0 %v382_v27  ;;  %v446_v20 = vld [vmem:[%s2310_s2 + $0x68] sm:$0xff]  ;;  %v447_v22 = vld [vmem:[%s2310_s2 + $0x70] sm:$0xff]  ;;  %v448_v23 = vld [vmem:[%s2310_s2 + $0x78] sm:$0xff]  ;;  %p1605_p5 = por %p1604_p3, %p1603_p1 }
  0x5f   : > { %1002 = vmatprep.subr.bf16.mxu1 %v384_v29  ;;  %487 = vperm.xlu0 %1518, %v437_v5   ;;  %v449_v24 = vld [vmem:[%s2310_s2 + $0x80] sm:$0xff]  ;;  %v450_v26 = vld [vmem:[%s2310_s2 + $0x88] sm:$0xff]  ;;  %v451_v28 = vld [vmem:[%s2310_s2 + $0x90] sm:$0xff] }
  0x60   : > { %492 = vperm.xlu1 %1519, %v438_v8   ;;  %v1532_v27 = vld [vmem:[%s2308_s0 + $0x44] ss:$8 sps:$4 sm:$0xff]   ;;  %v452_v29 = vld [vmem:[%s2310_s2 + $0x98] sm:$0xff]  ;;  %v1534_v31 = vld [vmem:[%s2308_s0 + $0x40] ss:$8 sps:$4 sm:$0xff]   ;;  %p1606_p6 = pnand %p1605_p5, %p1599_p0 }
  0x61   : > { %810 = vmatpush2.bf16.msra.mxu0 %v381_v34  ;;  %v453_v30 = vld [vmem:[%s2310_s2 + $0xa0] sm:$0xff]  ;;  %v454_v32 = vld [vmem:[%s2310_s2 + $0xa8] sm:$0xff]  ;;  %v1535_v33 = vld [vmem:[%s2308_s0 + $0x54] ss:$8 sps:$4 sm:$0xff]  }
  0x62   : > { %1003 = vmatpush2.bf16.msra.mxu1 %v383_v38  ;;  %811 = vmatprep.subr.bf16.mxu0 %v378_v39  ;;  %v455_v34 = vld [vmem:[%s2310_s2 + $0xb0] sm:$0xff]  ;;  %v456_v35 = vld [vmem:[%s2310_s2 + $0xb8] sm:$0xff]  ;;  %v457_v36 = vld [vmem:[%s2310_s2 + $0xc0] sm:$0xff] }
  0x63   : > { %1004 = vmatprep.subr.bf16.mxu1 %v380_v41  ;;  %497 = vperm.xlu0 %1518, %v439_v10   ;;  %v1537_v37 = vld [vmem:[%s2308_s0 + $0x50] ss:$8 sps:$4 sm:$0xff]   ;;  %v458_v38 = vld [vmem:[%s2310_s2 + $0xc8] sm:$0xff]  ;;  %v461_v42 = vld [vmem:[%s2310_s2 + $0xe0] sm:$0xff] }
  0x64   : > { %502 = vperm.xlu1 %1519, %v440_v11   ;;  %v1538_v39 = vld [vmem:[%s2308_s0 + $0x64] ss:$8 sps:$4 sm:$0xff]   ;;  %v459_v40 = vld [vmem:[%s2310_s2 + $0xd0] sm:$0xff]  ;;  %v460_v41 = vld [vmem:[%s2310_s2 + $0xd8] sm:$0xff] }
  0x65   : > { %812 = vmatpush2.bf16.msra.mxu0 %v377_v46  ;;  %v1540_v43 = vld [vmem:[%s2308_s0 + $0x60] ss:$8 sps:$4 sm:$0xff]   ;;  %v1541_v45 = vld [vmem:[%s2308_s0 + $0x74] ss:$8 sps:$4 sm:$0xff]   ;;  %v1543_v48 = vld [vmem:[%s2308_s0 + $0x70] ss:$8 sps:$4 sm:$0xff]  }
  0x66   : > { %1005 = vmatpush2.bf16.msra.mxu1 %v379_v49  ;;  %813 = vmatprep.subr.bf16.mxu0 %v374_v50  ;;  %v462_v44 = vld [vmem:[%s2310_s2 + $0xe8] sm:$0xff]  ;;  %v463_v46 = vld [vmem:[%s2310_s2 + $0xf0] sm:$0xff]  ;;  %v464_v47 = vld [vmem:[%s2310_s2 + $0xf8] sm:$0xff] }
  0x67   : > { %1006 = vmatprep.subr.bf16.mxu1 %v376_v52  ;;  %507 = vperm.xlu0 %1518, %v441_v12   ;;  %v1544_v49 = vld [vmem:[%s2308_s0 + $0x84] ss:$8 sps:$4 sm:$0xff]   ;;  %v1546_v50 = vld [vmem:[%s2308_s0 + $0x80] ss:$8 sps:$4 sm:$0xff]   ;;  %v1547_v51 = vld [vmem:[%s2308_s0 + $0x94] ss:$8 sps:$4 sm:$0xff]  }
  0x68   : > { %512 = vperm.xlu1 %1519, %v442_v14   ;;  %v1549_v52 = vld [vmem:[%s2308_s0 + $0x90] ss:$8 sps:$4 sm:$0xff]   ;;  %v1550_v53 = vld [vmem:[%s2308_s0 + $0xa4] ss:$8 sps:$4 sm:$0xff]   ;;  %v1552_v54 = vld [vmem:[%s2308_s0 + $0xa0] ss:$8 sps:$4 sm:$0xff]  }
  0x69   : > { %814 = vmatpush2.bf16.msra.mxu0 %v373_v57  ;;  %v1553_v55 = vld [vmem:[%s2308_s0 + $0xb4] ss:$8 sps:$4 sm:$0xff]   ;;  %v1555_v56 = vld [vmem:[%s2308_s0 + $0xb0] ss:$8 sps:$4 sm:$0xff]   ;;  %v1556_v57 = vld [vmem:[%s2308_s0 + $0xc4] ss:$8 sps:$4 sm:$0xff]  }
  0x6a   : > { %1007 = vmatpush2.bf16.msra.mxu1 %v375_v61  ;;  %815 = vmatprep.subr.bf16.mxu0 %v370_v62  ;;  %v1558_v58 = vld [vmem:[%s2308_s0 + $0xc0] ss:$8 sps:$4 sm:$0xff]   ;;  %v1559_v59 = vld [vmem:[%s2308_s0 + $0xd4] ss:$8 sps:$4 sm:$0xff]   ;;  %v1561_v60 = vld [vmem:[%s2308_s0 + $0xd0] ss:$8 sps:$4 sm:$0xff]  }
  0x6b   : > { %1008 = vmatprep.subr.bf16.mxu1 %v372_v0  ;;  %517 = vperm.xlu0 %1518, %v443_v16   ;;  %v1562_v61 = vld [vmem:[%s2308_s0 + $0xe4] ss:$8 sps:$4 sm:$0xff]   ;;  %v1564_v62 = vld [vmem:[%s2308_s0 + $0xe0] ss:$8 sps:$4 sm:$0xff]   ;;  %v1565_v63 = vld [vmem:[%s2308_s0 + $0xf4] ss:$8 sps:$4 sm:$0xff]  }
  0x6c   : > { %522 = vperm.xlu1 %1519, %v444_v17   ;;  %v1567_v0 = vld [vmem:[%s2308_s0 + $0xf0] ss:$8 sps:$4 sm:$0xff]  }
  0x6d   : > { %816 = vmatpush2.bf16.msra.mxu0 %v369_v4 }
  0x6e   : > { %1009 = vmatpush2.bf16.msra.mxu1 %v371_v6 }
  0x6f   : > { %527 = vperm.xlu0 %1518, %v445_v18  }
  0x70   : > { %818 = vmatmul.mubr.bf16.vlgmr.msra.gmra.mxu0 %v1520_v7  ;;  %532 = vperm.xlu1 %1519, %v446_v20  }
  0x71   : > { %1011 = vmatmul.mubr.bf16.vlgmr.msra.gmra.mxu1 %v1520_v7  ;;  %827 = vmatprep.mubr.bf16.mxu0 %v1523_v9 }
  0x72   : > { %1020 = vmatprep.mubr.bf16.mxu1 %v1523_v9 }
  0x73   : > { %537 = vperm.xlu0 %1518, %v447_v22  }
  0x74   : > { %542 = vperm.xlu1 %1519, %v448_v23  }
  0x77   : > { %547 = vperm.xlu0 %1518, %v449_v24  }
  0x78   : > { %828 = vmatmul.mubr.bf16.gmra.mxu0 %v1525_v13  ;;  %552 = vperm.xlu1 %1519, %v450_v26  }
  0x79   : > { %1021 = vmatmul.mubr.bf16.gmra.mxu1 %v1525_v13  ;;  %837 = vmatprep.mubr.bf16.mxu0 %v1526_v15 }
  0x7a   : > { %1030 = vmatprep.mubr.bf16.mxu1 %v1526_v15 }
  0x7b   : > { %557 = vperm.xlu0 %1518, %v451_v28  }
  0x7c   : > { %562 = vperm.xlu1 %1519, %v452_v29  }
  0x7f   : > { %567 = vperm.xlu0 %1518, %v453_v30  }
  0x80   : > { %838 = vmatmul.mubr.bf16.gmra.mxu0 %v1528_v19  ;;  %572 = vperm.xlu1 %1519, %v454_v32  }
  0x81   : > { %1031 = vmatmul.mubr.bf16.gmra.mxu1 %v1528_v19  ;;  %847 = vmatprep.mubr.bf16.mxu0 %v1529_v21 }
  0x82   : > { %1040 = vmatprep.mubr.bf16.mxu1 %v1529_v21 }
  0x83   : > { %577 = vperm.xlu0 %1518, %v455_v34  }
  0x84   : > { %582 = vperm.xlu1 %1519, %v456_v35  }
  0x87   : > { %587 = vperm.xlu0 %1518, %v457_v36  }
  0x88   : > { %848 = vmatmul.mubr.bf16.gmra.mxu0 %v1531_v25  ;;  %592 = vperm.xlu1 %1519, %v458_v38  }
  0x89   : > { %1041 = vmatmul.mubr.bf16.gmra.mxu1 %v1531_v25  ;;  %857 = vmatprep.mubr.bf16.mxu0 %v1532_v27 }
  0x8a   : > { %1050 = vmatprep.mubr.bf16.mxu1 %v1532_v27 }
  0x8b   : > { %597 = vperm.xlu0 %1518, %v459_v40  }
  0x8c   : > { %602 = vperm.xlu1 %1519, %v460_v41  }
  0x8f   : > { %607 = vperm.xlu0 %1518, %v461_v42  }
  0x90   : > { %858 = vmatmul.mubr.bf16.gmra.mxu0 %v1534_v31  ;;  %612 = vperm.xlu1 %1519, %v462_v44  }
  0x91   : > { %1051 = vmatmul.mubr.bf16.gmra.mxu1 %v1534_v31  ;;  %867 = vmatprep.mubr.bf16.mxu0 %v1535_v33 }
  0x92   : > { %1060 = vmatprep.mubr.bf16.mxu1 %v1535_v33 }
  0x93   : > { %617 = vperm.xlu0 %1518, %v463_v46  }
  0x94   : > { %622 = vperm.xlu1 %1519, %v464_v47  }
  0x98   : > { %868 = vmatmul.mubr.bf16.gmra.mxu0 %v1537_v37 }
  0x99   : > { %1061 = vmatmul.mubr.bf16.gmra.mxu1 %v1537_v37  ;;  %877 = vmatprep.mubr.bf16.mxu0 %v1538_v39 }
  0x9a   : > { %1070 = vmatprep.mubr.bf16.mxu1 %v1538_v39 }
  0xa0   : > { %878 = vmatmul.mubr.bf16.gmra.mxu0 %v1540_v43 }
  0xa1   : > { %1071 = vmatmul.mubr.bf16.gmra.mxu1 %v1540_v43  ;;  %887 = vmatprep.mubr.bf16.mxu0 %v1541_v45 }
  0xa2   : > { %1080 = vmatprep.mubr.bf16.mxu1 %v1541_v45 }
  0xa8   : > { %888 = vmatmul.mubr.bf16.gmra.mxu0 %v1543_v48 }
  0xa9   : > { %1081 = vmatmul.mubr.bf16.gmra.mxu1 %v1543_v48  ;;  %897 = vmatprep.mubr.bf16.mxu0 %v1544_v49 }
  0xaa   : > { %1090 = vmatprep.mubr.bf16.mxu1 %v1544_v49 }
  0xb0   : > { %898 = vmatmul.mubr.bf16.gmra.mxu0 %v1546_v50 }
  0xb1   : > { %1091 = vmatmul.mubr.bf16.gmra.mxu1 %v1546_v50  ;;  %907 = vmatprep.mubr.bf16.mxu0 %v1547_v51 }
  0xb2   : > { %1100 = vmatprep.mubr.bf16.mxu1 %v1547_v51 }
  0xb8   : > { %908 = vmatmul.mubr.bf16.gmra.mxu0 %v1549_v52 }
  0xb9   : > { %1101 = vmatmul.mubr.bf16.gmra.mxu1 %v1549_v52  ;;  %917 = vmatprep.mubr.bf16.mxu0 %v1550_v53 }
  0xba   : > { %1110 = vmatprep.mubr.bf16.mxu1 %v1550_v53 }
  0xc0   : > { %918 = vmatmul.mubr.bf16.gmra.mxu0 %v1552_v54 }
  0xc1   : > { %1111 = vmatmul.mubr.bf16.gmra.mxu1 %v1552_v54  ;;  %927 = vmatprep.mubr.bf16.mxu0 %v1553_v55 }
  0xc2   : > { %1120 = vmatprep.mubr.bf16.mxu1 %v1553_v55 }
  0xc8   : > { %928 = vmatmul.mubr.bf16.gmra.mxu0 %v1555_v56 }
  0xc9   : > { %1121 = vmatmul.mubr.bf16.gmra.mxu1 %v1555_v56  ;;  %937 = vmatprep.mubr.bf16.mxu0 %v1556_v57 }
  0xca   : > { %1130 = vmatprep.mubr.bf16.mxu1 %v1556_v57 }
  0xd0   : > { %938 = vmatmul.mubr.bf16.gmra.mxu0 %v1558_v58 }
  0xd1   : > { %1131 = vmatmul.mubr.bf16.gmra.mxu1 %v1558_v58  ;;  %947 = vmatprep.mubr.bf16.mxu0 %v1559_v59 }
  0xd2   : > { %1140 = vmatprep.mubr.bf16.mxu1 %v1559_v59  ;;  %v468_v1 = vpop.permute.xlu0 %467 }
  0xd3   : > { %v478_v15 = vpop.permute.xlu1 %477 }
  0xd6   : > { %v473_v7 = vpop.permute.xlu0 %472 }
  0xd7   : > { %v483_v27 = vpop.permute.xlu1 %482 }
  0xd8   : > { %948 = vmatmul.mubr.bf16.gmra.mxu0 %v1561_v60 }
  0xd9   : > { %1141 = vmatmul.mubr.bf16.gmra.mxu1 %v1561_v60  ;;  %957 = vmatprep.mubr.bf16.mxu0 %v1562_v61 }
  0xda   : > { %1150 = vmatprep.mubr.bf16.mxu1 %v1562_v61  ;;  %v488_v36 = vpop.permute.xlu0 %487 }
  0xdb   : > { %v493_v45 = vpop.permute.xlu1 %492 }
  0xde   : > { %v498_v54 = vpop.permute.xlu0 %497 }
  0xe0   : > { %958 = vmatmul.mubr.bf16.gmra.mxu0 %v1564_v62 }
  0xe1   : > { %1151 = vmatmul.mubr.bf16.gmra.mxu1 %v1564_v62  ;;  %967 = vmatprep.mubr.bf16.mxu0 %v1565_v63 }
  0xe2   : > { %1160 = vmatprep.mubr.bf16.mxu1 %v1565_v63  ;;  %v503_v63 = vpop.permute.xlu1 %502 }
  0xe8   : > { %968 = vmatmul.mubr.bf16.gmra.mxu0 %v1567_v0 }
  0xe9   : > { %1161 = vmatmul.mubr.bf16.gmra.mxu1 %v1567_v0 }
 0x130   : > { %v819_v2 = vpop.f32.mrf.mxu0 }
 0x131   : > { %v820_v3 = vadd.f32 %v819_v2, %v468_v1  ;;  %v1012_v4 = vpop.f32.mrf.mxu1 }
 0x132   : > { %v1013_v5 = vadd.f32 %v1012_v4, %v468_v1  ;;  %v821_v6 = vpop.f32.mrf.mxu0 }
 0x133   : > { %1171 = vst [vmem:[%s2123_s18] sm:$0xff] %v820_v3  ;;  %v822_v8 = vadd.f32 %v821_v6, %v468_v1  ;;  %v1014_v9 = vpop.f32.mrf.mxu1 }
 0x134   : > { %1173 = vst [vmem:[%s2123_s18 + $0x10] sm:$0xff] %v1013_v5  ;;  %v1015_v10 = vadd.f32 %v1014_v9, %v468_v1  ;;  %v823_v11 = vpop.f32.mrf.mxu0 }
 0x135   : > { %1172 = vst [vmem:[%s2123_s18 + $0x8] sm:$0xff] %v822_v8  ;;  %v824_v12 = vadd.f32 %v823_v11, %v473_v7  ;;  %v1016_v13 = vpop.f32.mrf.mxu1  ;;  %v508_v8 = vpop.permute.xlu0 %507 }
 0x136   : > { %1174 = vst [vmem:[%s2123_s18 + $0x18] sm:$0xff] %v1015_v10  ;;  %v1017_v14 = vadd.f32 %v1016_v13, %v473_v7  ;;  %v825_v16 = vpop.f32.mrf.mxu0 }
 0x137   : > { %1175 = vst [vmem:[%s2123_s18 + $0x20] sm:$0xff] %v824_v12  ;;  %v826_v17 = vadd.f32 %v825_v16, %v473_v7  ;;  %v1018_v18 = vpop.f32.mrf.mxu1 }
 0x138   : > { %1177 = vst [vmem:[%s2123_s18 + $0x30] sm:$0xff] %v1017_v14  ;;  %v1019_v19 = vadd.f32 %v1018_v18, %v473_v7  ;;  %v829_v20 = vpop.f32.mrf.mxu0 }
 0x139   : > { %1176 = vst [vmem:[%s2123_s18 + $0x28] sm:$0xff] %v826_v17  ;;  %v830_v21 = vadd.f32 %v829_v20, %v478_v15  ;;  %v1022_v22 = vpop.f32.mrf.mxu1  ;;  %v513_v17 = vpop.permute.xlu1 %512 }
 0x13a   : > { %1178 = vst [vmem:[%s2123_s18 + $0x38] sm:$0xff] %v1019_v19  ;;  %v1023_v23 = vadd.f32 %v1022_v22, %v478_v15  ;;  %v831_v24 = vpop.f32.mrf.mxu0 }
 0x13b   : > { %1179 = vst [vmem:[%s2123_s18 + $0x40] sm:$0xff] %v830_v21  ;;  %v832_v25 = vadd.f32 %v831_v24, %v478_v15  ;;  %v1024_v26 = vpop.f32.mrf.mxu1 }
 0x13c   : > { %1181 = vst [vmem:[%s2123_s18 + $0x50] sm:$0xff] %v1023_v23  ;;  %v1025_v28 = vadd.f32 %v1024_v26, %v478_v15  ;;  %v833_v29 = vpop.f32.mrf.mxu0  ;;  %v518_v26 = vpop.permute.xlu0 %517 }
 0x13d   : > { %1180 = vst [vmem:[%s2123_s18 + $0x48] sm:$0xff] %v832_v25  ;;  %v834_v30 = vadd.f32 %v833_v29, %v483_v27  ;;  %v1026_v31 = vpop.f32.mrf.mxu1 }
 0x13e   : > { %1182 = vst [vmem:[%s2123_s18 + $0x58] sm:$0xff] %v1025_v28  ;;  %v1027_v32 = vadd.f32 %v1026_v31, %v483_v27  ;;  %v835_v33 = vpop.f32.mrf.mxu0 }
 0x13f   : > { %1183 = vst [vmem:[%s2123_s18 + $0x60] sm:$0xff] %v834_v30  ;;  %v836_v34 = vadd.f32 %v835_v33, %v483_v27  ;;  %v1028_v35 = vpop.f32.mrf.mxu1 }
 0x140   : > { %1185 = vst [vmem:[%s2123_s18 + $0x70] sm:$0xff] %v1027_v32  ;;  %v1029_v37 = vadd.f32 %v1028_v35, %v483_v27  ;;  %v839_v38 = vpop.f32.mrf.mxu0  ;;  %v523_v35 = vpop.permute.xlu1 %522 }
 0x141   : > { %1184 = vst [vmem:[%s2123_s18 + $0x68] sm:$0xff] %v836_v34  ;;  %v840_v39 = vadd.f32 %v839_v38, %v488_v36  ;;  %v1032_v40 = vpop.f32.mrf.mxu1 }
 0x142   : > { %1186 = vst [vmem:[%s2123_s18 + $0x78] sm:$0xff] %v1029_v37  ;;  %v1033_v41 = vadd.f32 %v1032_v40, %v488_v36  ;;  %v841_v42 = vpop.f32.mrf.mxu0 }
 0x143   : > { %1187 = vst [vmem:[%s2123_s18 + $0x80] sm:$0xff] %v840_v39  ;;  %v842_v43 = vadd.f32 %v841_v42, %v488_v36  ;;  %v1034_v44 = vpop.f32.mrf.mxu1 }
 0x144   : > { %1189 = vst [vmem:[%s2123_s18 + $0x90] sm:$0xff] %v1033_v41  ;;  %v1035_v46 = vadd.f32 %v1034_v44, %v488_v36  ;;  %v843_v47 = vpop.f32.mrf.mxu0  ;;  %v528_v44 = vpop.permute.xlu0 %527 }
 0x145   : > { %1188 = vst [vmem:[%s2123_s18 + $0x88] sm:$0xff] %v842_v43  ;;  %v844_v48 = vadd.f32 %v843_v47, %v493_v45  ;;  %v1036_v49 = vpop.f32.mrf.mxu1 }
 0x146   : > { %1190 = vst [vmem:[%s2123_s18 + $0x98] sm:$0xff] %v1035_v46  ;;  %v1037_v50 = vadd.f32 %v1036_v49, %v493_v45  ;;  %v845_v51 = vpop.f32.mrf.mxu0 }
 0x147   : > { %1191 = vst [vmem:[%s2123_s18 + $0xa0] sm:$0xff] %v844_v48  ;;  %v846_v52 = vadd.f32 %v845_v51, %v493_v45  ;;  %v1038_v53 = vpop.f32.mrf.mxu1 }
 0x148   : > { %1193 = vst [vmem:[%s2123_s18 + $0xb0] sm:$0xff] %v1037_v50  ;;  %v1039_v55 = vadd.f32 %v1038_v53, %v493_v45  ;;  %v849_v56 = vpop.f32.mrf.mxu0  ;;  %v533_v53 = vpop.permute.xlu1 %532 }
 0x149   : > { %1192 = vst [vmem:[%s2123_s18 + $0xa8] sm:$0xff] %v846_v52  ;;  %v850_v57 = vadd.f32 %v849_v56, %v498_v54  ;;  %v1042_v58 = vpop.f32.mrf.mxu1 }
 0x14a   : > { %1194 = vst [vmem:[%s2123_s18 + $0xb8] sm:$0xff] %v1039_v55  ;;  %v1043_v59 = vadd.f32 %v1042_v58, %v498_v54  ;;  %v851_v60 = vpop.f32.mrf.mxu0 }
 0x14b   : > { %1195 = vst [vmem:[%s2123_s18 + $0xc0] sm:$0xff] %v850_v57  ;;  %v852_v61 = vadd.f32 %v851_v60, %v498_v54  ;;  %v1044_v62 = vpop.f32.mrf.mxu1 }
 0x14c   : > { %1197 = vst [vmem:[%s2123_s18 + $0xd0] sm:$0xff] %v1043_v59  ;;  %v1045_v0 = vadd.f32 %v1044_v62, %v498_v54  ;;  %v853_v1 = vpop.f32.mrf.mxu0  ;;  %v538_v62 = vpop.permute.xlu0 %537 }
 0x14d   : > { %1196 = vst [vmem:[%s2123_s18 + $0xc8] sm:$0xff] %v852_v61  ;;  %v854_v2 = vadd.f32 %v853_v1, %v503_v63  ;;  %v1046_v3 = vpop.f32.mrf.mxu1 }
 0x14e   : > { %1198 = vst [vmem:[%s2123_s18 + $0xd8] sm:$0xff] %v1045_v0  ;;  %v1047_v4 = vadd.f32 %v1046_v3, %v503_v63  ;;  %v855_v5 = vpop.f32.mrf.mxu0 }
 0x14f   : > { %1199 = vst [vmem:[%s2123_s18 + $0xe0] sm:$0xff] %v854_v2  ;;  %v856_v6 = vadd.f32 %v855_v5, %v503_v63  ;;  %v1048_v7 = vpop.f32.mrf.mxu1 }
 0x150   : > { %1201 = vst [vmem:[%s2123_s18 + $0xf0] sm:$0xff] %v1047_v4  ;;  %v1049_v9 = vadd.f32 %v1048_v7, %v503_v63  ;;  %v859_v10 = vpop.f32.mrf.mxu0  ;;  %v543_v7 = vpop.permute.xlu1 %542 }
 0x151   : > { %1200 = vst [vmem:[%s2123_s18 + $0xe8] sm:$0xff] %v856_v6  ;;  %v860_v11 = vadd.f32 %v859_v10, %v508_v8  ;;  %v1052_v12 = vpop.f32.mrf.mxu1 }
 0x152   : > { %1202 = vst [vmem:[%s2123_s18 + $0xf8] sm:$0xff] %v1049_v9  ;;  %v1053_v13 = vadd.f32 %v1052_v12, %v508_v8  ;;  %v861_v14 = vpop.f32.mrf.mxu0 }
 0x153   : > { %1203 = vst [vmem:[%s2123_s18 + $0x100] sm:$0xff] %v860_v11  ;;  %v862_v15 = vadd.f32 %v861_v14, %v508_v8  ;;  %v1054_v16 = vpop.f32.mrf.mxu1 }
 0x154   : > { %1205 = vst [vmem:[%s2123_s18 + $0x110] sm:$0xff] %v1053_v13  ;;  %v1055_v18 = vadd.f32 %v1054_v16, %v508_v8  ;;  %v863_v19 = vpop.f32.mrf.mxu0  ;;  %v548_v16 = vpop.permute.xlu0 %547 }
 0x155   : > { %1204 = vst [vmem:[%s2123_s18 + $0x108] sm:$0xff] %v862_v15  ;;  %v864_v20 = vadd.f32 %v863_v19, %v513_v17  ;;  %v1056_v21 = vpop.f32.mrf.mxu1 }
 0x156   : > { %1206 = vst [vmem:[%s2123_s18 + $0x118] sm:$0xff] %v1055_v18  ;;  %v1057_v22 = vadd.f32 %v1056_v21, %v513_v17  ;;  %v865_v23 = vpop.f32.mrf.mxu0 }
 0x157   : > { %1207 = vst [vmem:[%s2123_s18 + $0x120] sm:$0xff] %v864_v20  ;;  %v866_v24 = vadd.f32 %v865_v23, %v513_v17  ;;  %v1058_v25 = vpop.f32.mrf.mxu1 }
 0x158   : > { %1209 = vst [vmem:[%s2123_s18 + $0x130] sm:$0xff] %v1057_v22  ;;  %v1059_v27 = vadd.f32 %v1058_v25, %v513_v17  ;;  %v869_v28 = vpop.f32.mrf.mxu0  ;;  %v553_v25 = vpop.permute.xlu1 %552 }
 0x159   : > { %1208 = vst [vmem:[%s2123_s18 + $0x128] sm:$0xff] %v866_v24  ;;  %v870_v29 = vadd.f32 %v869_v28, %v518_v26  ;;  %v1062_v30 = vpop.f32.mrf.mxu1 }
 0x15a   : > { %1210 = vst [vmem:[%s2123_s18 + $0x138] sm:$0xff] %v1059_v27  ;;  %v1063_v31 = vadd.f32 %v1062_v30, %v518_v26  ;;  %v871_v32 = vpop.f32.mrf.mxu0 }
 0x15b   : > { %1211 = vst [vmem:[%s2123_s18 + $0x140] sm:$0xff] %v870_v29  ;;  %v872_v33 = vadd.f32 %v871_v32, %v518_v26  ;;  %v1064_v34 = vpop.f32.mrf.mxu1 }
 0x15c   : > { %1213 = vst [vmem:[%s2123_s18 + $0x150] sm:$0xff] %v1063_v31  ;;  %v1065_v36 = vadd.f32 %v1064_v34, %v518_v26  ;;  %v873_v37 = vpop.f32.mrf.mxu0  ;;  %v558_v34 = vpop.permute.xlu0 %557 }
 0x15d   : > { %1212 = vst [vmem:[%s2123_s18 + $0x148] sm:$0xff] %v872_v33  ;;  %v874_v38 = vadd.f32 %v873_v37, %v523_v35  ;;  %v1066_v39 = vpop.f32.mrf.mxu1 }
 0x15e   : > { %1214 = vst [vmem:[%s2123_s18 + $0x158] sm:$0xff] %v1065_v36  ;;  %v1067_v40 = vadd.f32 %v1066_v39, %v523_v35  ;;  %v875_v41 = vpop.f32.mrf.mxu0 }
 0x15f   : > { %1215 = vst [vmem:[%s2123_s18 + $0x160] sm:$0xff] %v874_v38  ;;  %v876_v42 = vadd.f32 %v875_v41, %v523_v35  ;;  %v1068_v43 = vpop.f32.mrf.mxu1 }
 0x160   : > { %1217 = vst [vmem:[%s2123_s18 + $0x170] sm:$0xff] %v1067_v40  ;;  %v1069_v45 = vadd.f32 %v1068_v43, %v523_v35  ;;  %v879_v46 = vpop.f32.mrf.mxu0  ;;  %v563_v43 = vpop.permute.xlu1 %562 }
 0x161   : > { %1216 = vst [vmem:[%s2123_s18 + $0x168] sm:$0xff] %v876_v42  ;;  %v880_v47 = vadd.f32 %v879_v46, %v528_v44  ;;  %v1072_v48 = vpop.f32.mrf.mxu1 }
 0x162   : > { %1218 = vst [vmem:[%s2123_s18 + $0x178] sm:$0xff] %v1069_v45  ;;  %v1073_v49 = vadd.f32 %v1072_v48, %v528_v44  ;;  %v881_v50 = vpop.f32.mrf.mxu0 }
 0x163   : > { %1219 = vst [vmem:[%s2123_s18 + $0x180] sm:$0xff] %v880_v47  ;;  %v882_v51 = vadd.f32 %v881_v50, %v528_v44  ;;  %v1074_v52 = vpop.f32.mrf.mxu1 }
 0x164   : > { %1221 = vst [vmem:[%s2123_s18 + $0x190] sm:$0xff] %v1073_v49  ;;  %v1075_v54 = vadd.f32 %v1074_v52, %v528_v44  ;;  %v883_v55 = vpop.f32.mrf.mxu0  ;;  %v568_v52 = vpop.permute.xlu0 %567 }
 0x165   : > { %1220 = vst [vmem:[%s2123_s18 + $0x188] sm:$0xff] %v882_v51  ;;  %v884_v56 = vadd.f32 %v883_v55, %v533_v53  ;;  %v1076_v57 = vpop.f32.mrf.mxu1 }
 0x166   : > { %1222 = vst [vmem:[%s2123_s18 + $0x198] sm:$0xff] %v1075_v54  ;;  %v1077_v58 = vadd.f32 %v1076_v57, %v533_v53  ;;  %v885_v59 = vpop.f32.mrf.mxu0 }
 0x167   : > { %1223 = vst [vmem:[%s2123_s18 + $0x1a0] sm:$0xff] %v884_v56  ;;  %v886_v60 = vadd.f32 %v885_v59, %v533_v53  ;;  %v1078_v61 = vpop.f32.mrf.mxu1 }
 0x168   : > { %1225 = vst [vmem:[%s2123_s18 + $0x1b0] sm:$0xff] %v1077_v58  ;;  %v1079_v63 = vadd.f32 %v1078_v61, %v533_v53  ;;  %v889_v0 = vpop.f32.mrf.mxu0  ;;  %v573_v61 = vpop.permute.xlu1 %572 }
 0x169   : > { %1224 = vst [vmem:[%s2123_s18 + $0x1a8] sm:$0xff] %v886_v60  ;;  %v890_v1 = vadd.f32 %v889_v0, %v538_v62  ;;  %v1082_v2 = vpop.f32.mrf.mxu1 }
 0x16a   : > { %1226 = vst [vmem:[%s2123_s18 + $0x1b8] sm:$0xff] %v1079_v63  ;;  %v1083_v3 = vadd.f32 %v1082_v2, %v538_v62  ;;  %v891_v4 = vpop.f32.mrf.mxu0 }
 0x16b   : > { %1227 = vst [vmem:[%s2123_s18 + $0x1c0] sm:$0xff] %v890_v1  ;;  %v892_v5 = vadd.f32 %v891_v4, %v538_v62  ;;  %v1084_v6 = vpop.f32.mrf.mxu1 }
 0x16c   : > { %1229 = vst [vmem:[%s2123_s18 + $0x1d0] sm:$0xff] %v1083_v3  ;;  %v1085_v8 = vadd.f32 %v1084_v6, %v538_v62  ;;  %v893_v9 = vpop.f32.mrf.mxu0  ;;  %v578_v6 = vpop.permute.xlu0 %577 }
 0x16d   : > { %1228 = vst [vmem:[%s2123_s18 + $0x1c8] sm:$0xff] %v892_v5  ;;  %v894_v10 = vadd.f32 %v893_v9, %v543_v7  ;;  %v1086_v11 = vpop.f32.mrf.mxu1 }
 0x16e   : > { %1230 = vst [vmem:[%s2123_s18 + $0x1d8] sm:$0xff] %v1085_v8  ;;  %v1087_v12 = vadd.f32 %v1086_v11, %v543_v7  ;;  %v895_v13 = vpop.f32.mrf.mxu0 }
 0x16f   : > { %1231 = vst [vmem:[%s2123_s18 + $0x1e0] sm:$0xff] %v894_v10  ;;  %v896_v14 = vadd.f32 %v895_v13, %v543_v7  ;;  %v1088_v15 = vpop.f32.mrf.mxu1 }
 0x170   : > { %1233 = vst [vmem:[%s2123_s18 + $0x1f0] sm:$0xff] %v1087_v12  ;;  %v1089_v17 = vadd.f32 %v1088_v15, %v543_v7  ;;  %v899_v18 = vpop.f32.mrf.mxu0  ;;  %v583_v15 = vpop.permute.xlu1 %582 }
 0x171   : > { %1232 = vst [vmem:[%s2123_s18 + $0x1e8] sm:$0xff] %v896_v14  ;;  %v900_v19 = vadd.f32 %v899_v18, %v548_v16  ;;  %v1092_v20 = vpop.f32.mrf.mxu1 }
 0x172   : > { %1234 = vst [vmem:[%s2123_s18 + $0x1f8] sm:$0xff] %v1089_v17  ;;  %v1093_v21 = vadd.f32 %v1092_v20, %v548_v16  ;;  %v901_v22 = vpop.f32.mrf.mxu0 }
 0x173   : > { %1235 = vst [vmem:[%s2123_s18 + $0x200] sm:$0xff] %v900_v19  ;;  %v902_v23 = vadd.f32 %v901_v22, %v548_v16  ;;  %v1094_v24 = vpop.f32.mrf.mxu1 }
 0x174   : > { %1237 = vst [vmem:[%s2123_s18 + $0x210] sm:$0xff] %v1093_v21  ;;  %v1095_v26 = vadd.f32 %v1094_v24, %v548_v16  ;;  %v903_v27 = vpop.f32.mrf.mxu0  ;;  %v588_v24 = vpop.permute.xlu0 %587 }
 0x175   : > { %1236 = vst [vmem:[%s2123_s18 + $0x208] sm:$0xff] %v902_v23  ;;  %v904_v28 = vadd.f32 %v903_v27, %v553_v25  ;;  %v1096_v29 = vpop.f32.mrf.mxu1 }
 0x176   : > { %1238 = vst [vmem:[%s2123_s18 + $0x218] sm:$0xff] %v1095_v26  ;;  %v1097_v30 = vadd.f32 %v1096_v29, %v553_v25  ;;  %v905_v31 = vpop.f32.mrf.mxu0 }
 0x177   : > { %1239 = vst [vmem:[%s2123_s18 + $0x220] sm:$0xff] %v904_v28  ;;  %v906_v32 = vadd.f32 %v905_v31, %v553_v25  ;;  %v1098_v33 = vpop.f32.mrf.mxu1 }
 0x178   : > { %1241 = vst [vmem:[%s2123_s18 + $0x230] sm:$0xff] %v1097_v30  ;;  %v1099_v35 = vadd.f32 %v1098_v33, %v553_v25  ;;  %v909_v36 = vpop.f32.mrf.mxu0  ;;  %v593_v33 = vpop.permute.xlu1 %592 }
 0x179   : > { %1240 = vst [vmem:[%s2123_s18 + $0x228] sm:$0xff] %v906_v32  ;;  %v910_v37 = vadd.f32 %v909_v36, %v558_v34  ;;  %v1102_v38 = vpop.f32.mrf.mxu1 }
 0x17a   : > { %1242 = vst [vmem:[%s2123_s18 + $0x238] sm:$0xff] %v1099_v35  ;;  %v1103_v39 = vadd.f32 %v1102_v38, %v558_v34  ;;  %v911_v40 = vpop.f32.mrf.mxu0 }
 0x17b   : > { %1243 = vst [vmem:[%s2123_s18 + $0x240] sm:$0xff] %v910_v37  ;;  %v912_v41 = vadd.f32 %v911_v40, %v558_v34  ;;  %v1104_v42 = vpop.f32.mrf.mxu1 }
 0x17c   : > { %1245 = vst [vmem:[%s2123_s18 + $0x250] sm:$0xff] %v1103_v39  ;;  %v1105_v44 = vadd.f32 %v1104_v42, %v558_v34  ;;  %v913_v45 = vpop.f32.mrf.mxu0  ;;  %v598_v42 = vpop.permute.xlu0 %597 }
 0x17d   : > { %1244 = vst [vmem:[%s2123_s18 + $0x248] sm:$0xff] %v912_v41  ;;  %v914_v46 = vadd.f32 %v913_v45, %v563_v43  ;;  %v1106_v47 = vpop.f32.mrf.mxu1 }
 0x17e   : > { %1246 = vst [vmem:[%s2123_s18 + $0x258] sm:$0xff] %v1105_v44  ;;  %v1107_v48 = vadd.f32 %v1106_v47, %v563_v43  ;;  %v915_v49 = vpop.f32.mrf.mxu0 }
 0x17f   : > { %1247 = vst [vmem:[%s2123_s18 + $0x260] sm:$0xff] %v914_v46  ;;  %v916_v50 = vadd.f32 %v915_v49, %v563_v43  ;;  %v1108_v51 = vpop.f32.mrf.mxu1 }
 0x180   : > { %1249 = vst [vmem:[%s2123_s18 + $0x270] sm:$0xff] %v1107_v48  ;;  %v1109_v53 = vadd.f32 %v1108_v51, %v563_v43  ;;  %v919_v54 = vpop.f32.mrf.mxu0  ;;  %v603_v51 = vpop.permute.xlu1 %602 }
 0x181   : > { %1248 = vst [vmem:[%s2123_s18 + $0x268] sm:$0xff] %v916_v50  ;;  %v920_v55 = vadd.f32 %v919_v54, %v568_v52  ;;  %v1112_v56 = vpop.f32.mrf.mxu1 }
 0x182   : > { %1250 = vst [vmem:[%s2123_s18 + $0x278] sm:$0xff] %v1109_v53  ;;  %v1113_v57 = vadd.f32 %v1112_v56, %v568_v52  ;;  %v921_v58 = vpop.f32.mrf.mxu0 }
 0x183   : > { %1251 = vst [vmem:[%s2123_s18 + $0x280] sm:$0xff] %v920_v55  ;;  %v922_v59 = vadd.f32 %v921_v58, %v568_v52  ;;  %v1114_v60 = vpop.f32.mrf.mxu1 }
 0x184   : > { %1253 = vst [vmem:[%s2123_s18 + $0x290] sm:$0xff] %v1113_v57  ;;  %v1115_v62 = vadd.f32 %v1114_v60, %v568_v52  ;;  %v923_v63 = vpop.f32.mrf.mxu0  ;;  %v608_v60 = vpop.permute.xlu0 %607 }
 0x185   : > { %1252 = vst [vmem:[%s2123_s18 + $0x288] sm:$0xff] %v922_v59  ;;  %v924_v0 = vadd.f32 %v923_v63, %v573_v61  ;;  %v1116_v1 = vpop.f32.mrf.mxu1 }
 0x186   : > { %1254 = vst [vmem:[%s2123_s18 + $0x298] sm:$0xff] %v1115_v62  ;;  %v1117_v2 = vadd.f32 %v1116_v1, %v573_v61  ;;  %v925_v3 = vpop.f32.mrf.mxu0 }
 0x187   : > { %1255 = vst [vmem:[%s2123_s18 + $0x2a0] sm:$0xff] %v924_v0  ;;  %v926_v4 = vadd.f32 %v925_v3, %v573_v61  ;;  %v1118_v5 = vpop.f32.mrf.mxu1 }
 0x188   : > { %1257 = vst [vmem:[%s2123_s18 + $0x2b0] sm:$0xff] %v1117_v2  ;;  %v1119_v7 = vadd.f32 %v1118_v5, %v573_v61  ;;  %v929_v8 = vpop.f32.mrf.mxu0  ;;  %v613_v5 = vpop.permute.xlu1 %612 }
 0x189   : > { %1256 = vst [vmem:[%s2123_s18 + $0x2a8] sm:$0xff] %v926_v4  ;;  %v930_v9 = vadd.f32 %v929_v8, %v578_v6  ;;  %v1122_v10 = vpop.f32.mrf.mxu1 }
 0x18a   : > { %1258 = vst [vmem:[%s2123_s18 + $0x2b8] sm:$0xff] %v1119_v7  ;;  %v1123_v11 = vadd.f32 %v1122_v10, %v578_v6  ;;  %v931_v12 = vpop.f32.mrf.mxu0 }
 0x18b   : > { %1259 = vst [vmem:[%s2123_s18 + $0x2c0] sm:$0xff] %v930_v9  ;;  %v932_v13 = vadd.f32 %v931_v12, %v578_v6  ;;  %v1124_v14 = vpop.f32.mrf.mxu1 }
 0x18c   : > { %1261 = vst [vmem:[%s2123_s18 + $0x2d0] sm:$0xff] %v1123_v11  ;;  %v1125_v16 = vadd.f32 %v1124_v14, %v578_v6  ;;  %v933_v17 = vpop.f32.mrf.mxu0  ;;  %v618_v14 = vpop.permute.xlu0 %617 }
 0x18d   : > { %1260 = vst [vmem:[%s2123_s18 + $0x2c8] sm:$0xff] %v932_v13  ;;  %v934_v18 = vadd.f32 %v933_v17, %v583_v15  ;;  %v1126_v19 = vpop.f32.mrf.mxu1 }
 0x18e   : > { %1262 = vst [vmem:[%s2123_s18 + $0x2d8] sm:$0xff] %v1125_v16  ;;  %v1127_v20 = vadd.f32 %v1126_v19, %v583_v15  ;;  %v935_v21 = vpop.f32.mrf.mxu0 }
 0x18f   : > { %1263 = vst [vmem:[%s2123_s18 + $0x2e0] sm:$0xff] %v934_v18  ;;  %v936_v22 = vadd.f32 %v935_v21, %v583_v15  ;;  %v1128_v23 = vpop.f32.mrf.mxu1 }
 0x190   : > { %1265 = vst [vmem:[%s2123_s18 + $0x2f0] sm:$0xff] %v1127_v20  ;;  %v1129_v25 = vadd.f32 %v1128_v23, %v583_v15  ;;  %v939_v26 = vpop.f32.mrf.mxu0  ;;  %v623_v23 = vpop.permute.xlu1 %622 }
 0x191   : > { %1264 = vst [vmem:[%s2123_s18 + $0x2e8] sm:$0xff] %v936_v22  ;;  %v940_v27 = vadd.f32 %v939_v26, %v588_v24  ;;  %v1132_v28 = vpop.f32.mrf.mxu1 }
 0x192   : > { %1266 = vst [vmem:[%s2123_s18 + $0x2f8] sm:$0xff] %v1129_v25  ;;  %v1133_v29 = vadd.f32 %v1132_v28, %v588_v24  ;;  %v941_v30 = vpop.f32.mrf.mxu0 }
 0x193   : > { %1267 = vst [vmem:[%s2123_s18 + $0x300] sm:$0xff] %v940_v27  ;;  %v942_v31 = vadd.f32 %v941_v30, %v588_v24  ;;  %v1134_v32 = vpop.f32.mrf.mxu1 }
 0x194   : > { %1269 = vst [vmem:[%s2123_s18 + $0x310] sm:$0xff] %v1133_v29  ;;  %v1135_v34 = vadd.f32 %v1134_v32, %v588_v24  ;;  %v943_v35 = vpop.f32.mrf.mxu0 }
 0x195   : > { %1268 = vst [vmem:[%s2123_s18 + $0x308] sm:$0xff] %v942_v31  ;;  %v944_v36 = vadd.f32 %v943_v35, %v593_v33  ;;  %v1136_v37 = vpop.f32.mrf.mxu1 }
 0x196   : > { %1270 = vst [vmem:[%s2123_s18 + $0x318] sm:$0xff] %v1135_v34  ;;  %v1137_v38 = vadd.f32 %v1136_v37, %v593_v33  ;;  %v945_v39 = vpop.f32.mrf.mxu0 }
 0x197   : > { %1271 = vst [vmem:[%s2123_s18 + $0x320] sm:$0xff] %v944_v36  ;;  %v946_v40 = vadd.f32 %v945_v39, %v593_v33  ;;  %v1138_v41 = vpop.f32.mrf.mxu1 }
 0x198   : > { %1273 = vst [vmem:[%s2123_s18 + $0x330] sm:$0xff] %v1137_v38  ;;  %v1139_v43 = vadd.f32 %v1138_v41, %v593_v33  ;;  %v949_v44 = vpop.f32.mrf.mxu0 }
 0x199   : > { %1272 = vst [vmem:[%s2123_s18 + $0x328] sm:$0xff] %v946_v40  ;;  %v950_v45 = vadd.f32 %v949_v44, %v598_v42  ;;  %v1142_v46 = vpop.f32.mrf.mxu1 }
 0x19a   : > { %1274 = vst [vmem:[%s2123_s18 + $0x338] sm:$0xff] %v1139_v43  ;;  %v1143_v47 = vadd.f32 %v1142_v46, %v598_v42  ;;  %v951_v48 = vpop.f32.mrf.mxu0 }
 0x19b   : > { %1275 = vst [vmem:[%s2123_s18 + $0x340] sm:$0xff] %v950_v45  ;;  %v952_v49 = vadd.f32 %v951_v48, %v598_v42  ;;  %v1144_v50 = vpop.f32.mrf.mxu1 }
 0x19c   : > { %1277 = vst [vmem:[%s2123_s18 + $0x350] sm:$0xff] %v1143_v47  ;;  %v1145_v52 = vadd.f32 %v1144_v50, %v598_v42  ;;  %v953_v53 = vpop.f32.mrf.mxu0 }
 0x19d   : > { %1276 = vst [vmem:[%s2123_s18 + $0x348] sm:$0xff] %v952_v49  ;;  %v954_v54 = vadd.f32 %v953_v53, %v603_v51  ;;  %v1146_v55 = vpop.f32.mrf.mxu1 }
 0x19e   : > { %1278 = vst [vmem:[%s2123_s18 + $0x358] sm:$0xff] %v1145_v52  ;;  %v1147_v56 = vadd.f32 %v1146_v55, %v603_v51  ;;  %v955_v57 = vpop.f32.mrf.mxu0 }
 0x19f   : > { %1279 = vst [vmem:[%s2123_s18 + $0x360] sm:$0xff] %v954_v54  ;;  %v956_v58 = vadd.f32 %v955_v57, %v603_v51  ;;  %v1148_v59 = vpop.f32.mrf.mxu1 }
 0x1a0   : > { %1281 = vst [vmem:[%s2123_s18 + $0x370] sm:$0xff] %v1147_v56  ;;  %v1149_v61 = vadd.f32 %v1148_v59, %v603_v51  ;;  %v959_v62 = vpop.f32.mrf.mxu0 }
 0x1a1   : > { %1280 = vst [vmem:[%s2123_s18 + $0x368] sm:$0xff] %v956_v58  ;;  %v960_v63 = vadd.f32 %v959_v62, %v608_v60  ;;  %v1152_v0 = vpop.f32.mrf.mxu1 }
 0x1a2   : > { %1282 = vst [vmem:[%s2123_s18 + $0x378] sm:$0xff] %v1149_v61  ;;  %v1153_v1 = vadd.f32 %v1152_v0, %v608_v60  ;;  %v961_v2 = vpop.f32.mrf.mxu0 }
 0x1a3   : > { %1283 = vst [vmem:[%s2123_s18 + $0x380] sm:$0xff] %v960_v63  ;;  %v962_v3 = vadd.f32 %v961_v2, %v608_v60  ;;  %v1154_v4 = vpop.f32.mrf.mxu1 }
 0x1a4   : > { %1285 = vst [vmem:[%s2123_s18 + $0x390] sm:$0xff] %v1153_v1  ;;  %v1155_v6 = vadd.f32 %v1154_v4, %v608_v60  ;;  %v963_v7 = vpop.f32.mrf.mxu0 }
 0x1a5   : > { %1284 = vst [vmem:[%s2123_s18 + $0x388] sm:$0xff] %v962_v3  ;;  %v964_v8 = vadd.f32 %v963_v7, %v613_v5  ;;  %v1156_v9 = vpop.f32.mrf.mxu1 }
 0x1a6   : > { %1286 = vst [vmem:[%s2123_s18 + $0x398] sm:$0xff] %v1155_v6  ;;  %v1157_v10 = vadd.f32 %v1156_v9, %v613_v5  ;;  %v965_v11 = vpop.f32.mrf.mxu0 }
 0x1a7   : > { %1287 = vst [vmem:[%s2123_s18 + $0x3a0] sm:$0xff] %v964_v8  ;;  %v966_v12 = vadd.f32 %v965_v11, %v613_v5  ;;  %v1158_v13 = vpop.f32.mrf.mxu1 }
 0x1a8   : > { %1289 = vst [vmem:[%s2123_s18 + $0x3b0] sm:$0xff] %v1157_v10  ;;  %v1159_v15 = vadd.f32 %v1158_v13, %v613_v5  ;;  %v969_v16 = vpop.f32.mrf.mxu0 }
 0x1a9   : > { %1288 = vst [vmem:[%s2123_s18 + $0x3a8] sm:$0xff] %v966_v12  ;;  %v970_v17 = vadd.f32 %v969_v16, %v618_v14  ;;  %v1162_v18 = vpop.f32.mrf.mxu1 }
 0x1aa   : > { %1290 = vst [vmem:[%s2123_s18 + $0x3b8] sm:$0xff] %v1159_v15  ;;  %v1163_v19 = vadd.f32 %v1162_v18, %v618_v14  ;;  %v971_v20 = vpop.f32.mrf.mxu0 }
 0x1ab   : > { %1291 = vst [vmem:[%s2123_s18 + $0x3c0] sm:$0xff] %v970_v17  ;;  %v972_v21 = vadd.f32 %v971_v20, %v618_v14  ;;  %v1164_v22 = vpop.f32.mrf.mxu1 }
 0x1ac   : > { %1293 = vst [vmem:[%s2123_s18 + $0x3d0] sm:$0xff] %v1163_v19  ;;  %v1165_v24 = vadd.f32 %v1164_v22, %v618_v14  ;;  %v973_v25 = vpop.f32.mrf.mxu0 }
 0x1ad   : > { %1292 = vst [vmem:[%s2123_s18 + $0x3c8] sm:$0xff] %v972_v21  ;;  %v974_v26 = vadd.f32 %v973_v25, %v623_v23  ;;  %v1166_v27 = vpop.f32.mrf.mxu1 }
 0x1ae   : > { %1294 = vst [vmem:[%s2123_s18 + $0x3d8] sm:$0xff] %v1165_v24  ;;  %v1167_v28 = vadd.f32 %v1166_v27, %v623_v23  ;;  %v975_v29 = vpop.f32.mrf.mxu0 }
 0x1af   : > { %1295 = vst [vmem:[%s2123_s18 + $0x3e0] sm:$0xff] %v974_v26  ;;  %v976_v30 = vadd.f32 %v975_v29, %v623_v23  ;;  %v1168_v31 = vpop.f32.mrf.mxu1 }
 0x1b0   : > { %1297 = vst [vmem:[%s2123_s18 + $0x3f0] sm:$0xff] %v1167_v28  ;;  %v1169_v32 = vadd.f32 %v1168_v31, %v623_v23 }
 0x1b1   : > { %1296 = vst [vmem:[%s2123_s18 + $0x3e8] sm:$0xff] %v976_v30 }
 0x1b2   : > { %1298 = vst [vmem:[%s2123_s18 + $0x3f8] sm:$0xff] %v1169_v32 }
 0x1b3   : > { %1609 = shalt.err (!%p1606_p6)
}
 0x1b4   : > { %s1610_s6 = scalar_lea.hbm %s2255_s23, 16384  ;;  %s1614_s9 = scalar_lea.hbm %s2311_s3, 32768 }
 0x1b5   : > { %p1611_p7 = scmp.ne.s32.totalorder %s2255_s23, %s1610_s6  ;;  %p1615_p13 = scmp.lt.s32.totalorder %s2255_s23, %s2311_s3 }
 0x1b6   : > { %p1616_p2 = scmp.lt.s32.totalorder %s1614_s9, %s1610_s6 }
 0x1b7   : > { %p1612_p10 = pnand %p1611_p7, %p1756_p9 }
 0x1b8   : > { %p1617_p8 = por %p1616_p2, %p1615_p13 }
 0x1b9   : > { %p1613_p4 = pneg %p1612_p10 }
 0x1bb   : > { %p1618_p12 = pnand %p1617_p8, %p1613_p4 }
 0x1bd   : > { %1621 = shalt.err (!%p1618_p12)
}
 0x1be   : > { %s1683_s18 = smov 512   ;;  %s1684_s29 = smov 32  }
 0x1bf   : > { %1453 = dma.vmem_to_hbm [thread:$0]  (%p1756_p9), %s2257_s19, 16384, %s2255_s23, %s1300_s15, %s1683_s18, %s1683_s18, %s1684_s29  }
 0x1c0 PF: > { %s1330_s21 = sand.u32 1, %s1656_s12   ;;  %p2317_p0 = scmp.ge.s32.totalorder %s1676_s17, 2 }
 0x1c1   : > { %s1331_s22 = scalar_lea.sflag [#allocation4], %s1330_s21 }
 0x1c2   : > { %p1460_p1 = pnand %p2317_p0, %p1763_p11 }
 0x1c4   : > { %p1461_p3 = pneg %p1460_p1 }
 0x1c6   : > { %1651 = dma.done.wait (%p1461_p3), %s1331_s22, 16384  }
 0x1c7   : > { %1653 = vsyncadd (%p1461_p3), %s1331_s22, 4294950912  ;;  %s19_s17 = sadd.s32 1, %s1676_s17   ;;  %s2318_s12 = smov %s1660_s13 }
 0x1c8   : > { %p16_p5 = scmp.ge.s32.totalorder %s19_s17, 4   ;;  %s2319_s13 = smov %s1664_s14 }
 0x1c9   : > { %s2320_s14 = smov %s1761_s26  ;;  %s2321_s15 = smov %s1672_s16 }
 0x1ca   : > { %s2322_s16 = smov %s2324_s20  ;;  %18 = sbr.rel (!%p16_p5) target bundleno = 6 (0x6), region = 77 }
 0x1cf   :  { %1336 = vsyncpa [#allocation3], 1 }
 0x1d0   :  { %1338 = vsyncpa [#allocation3 + $0x1], 1 }
 0x1d1   :  { %1339 = vsyncpa [#allocation4], 1 }
 0x1d2   :  { %1341 = vsyncpa [#allocation4 + $0x1], 1 }

</bundles_post_ra>
